<compile_context>
chip_gen: v7x
topology: tpu7x:2x2x1
jax: 0.10.0
libtpu: 0.0.40
codegen_flags: <defaults>
</compile_context>

<pallas_src>
import jax
import jax.numpy as jnp
from jax.experimental import pallas as pl
from jax.experimental.pallas import tpu as pltpu

EPS = 1e-5
LANE = 128
VMEM_LIMIT = 48 * 1024 * 1024   # explicit; leaves headroom on v7x (64 MiB / TC)


# --------------------------------------------------------------------------
# kernel A: conv1 (im2col matmul) + partial BN1 statistics (one image / step)
# --------------------------------------------------------------------------
def _conv1_kernel(xp_ref, w1_ref, y1_ref, s1_ref, ss1_ref, col_ref):
    # xp_ref : (1, H+2, W+2, Cp) f32  spatially zero-padded, channel-padded x
    # w1_ref : (9*Cp, Cp)        bf16 conv1 weights, rows ordered (ky,kx,ci)
    # y1_ref : (1, H, W, Cp)     bf16 pre-BN conv1 output
    # s1_ref : (1, 1, Cp)        f32  per-image channel sum of y1
    # ss1_ref: (1, 1, Cp)        f32  per-image channel sum of y1^2
    # col_ref: (H*W, 9*Cp)       bf16 VMEM im2col scratch
    _, Hp, Wp, Cp = xp_ref.shape
    H, W = Hp - 2, Wp - 2

    # Build im2col: 9 shifted patches, each written once into a lane-aligned
    # column block (cast to bf16 fused into the copy).
    for ky in range(3):
        for kx in range(3):
            tap = ky * 3 + kx
            patch = xp_ref[0, ky:ky + H, kx:kx + W, :]            # (H, W, Cp) f32
            col_ref[:, tap * Cp:(tap + 1) * Cp] = (
                patch.reshape(H * W, Cp).astype(jnp.bfloat16))

    # One big MXU matmul, partial sums accumulate inside the MXU (K = 9*Cp).
    acc = jnp.dot(col_ref[...], w1_ref[...],
                  preferred_element_type=jnp.float32)              # (H*W, Cp) f32

    y1_ref[...] = acc.astype(y1_ref.dtype).reshape(1, H, W, Cp)
    s1_ref[...] = jnp.sum(acc, axis=0, keepdims=True).reshape(1, 1, Cp)
    ss1_ref[...] = jnp.sum(acc * acc, axis=0, keepdims=True).reshape(1, 1, Cp)


# --------------------------------------------------------------------------
# kernel B: bn1-affine + relu + conv2 (im2col matmul) + partial BN2 statistics
# --------------------------------------------------------------------------
def _conv2_kernel(y1_ref, w2_ref, sc1_ref, sh1_ref,
                  y2_ref, s2_ref, ss2_ref, a1p_ref, col_ref):
    # y1_ref : (1, H, W, Cp)  bf16  pre-BN conv1 output
    # w2_ref : (9*Cp, Cp)     bf16  conv2 weights
    # sc1/sh1: (1, 1, Cp)     f32   folded BN1 scale / shift
    # y2_ref : (1, H, W, Cp)  bf16  pre-BN conv2 output
    # s2/ss2 : (1, 1, Cp)     f32   per-image channel sum / sum-of-squares
    # a1p_ref: (H+2, W+2, Cp) f32   VMEM scratch: padded activation for conv2
    # col_ref: (H*W, 9*Cp)    bf16  VMEM im2col scratch
    _, H, W, Cp = y1_ref.shape

    # bn1 affine + relu (batch statistics already folded into scale/shift)
    a1 = jnp.maximum(
        y1_ref[0].astype(jnp.float32) * sc1_ref[0] + sh1_ref[0], 0.0)  # (H,W,Cp)

    # Zero only the 1-wide border ring, then write the interior once.
    # (Ring is re-zeroed every step: cheap, and correct even when the grid is
    #  sharded across megacore TCs with per-core scratch buffers.)
    zrow = jnp.zeros((1, W + 2, Cp), jnp.float32)
    zcol = jnp.zeros((H + 2, 1, Cp), jnp.float32)
    a1p_ref[0:1, :, :] = zrow
    a1p_ref[H + 1:H + 2, :, :] = zrow
    a1p_ref[:, 0:1, :] = zcol
    a1p_ref[:, W + 1:W + 2, :] = zcol
    a1p_ref[1:H + 1, 1:W + 1, :] = a1

    # im2col for conv2 (same layout as kernel A).
    for ky in range(3):
        for kx in range(3):
            tap = ky * 3 + kx
            patch = a1p_ref[ky:ky + H, kx:kx + W, :]
            col_ref[:, tap * Cp:(tap + 1) * Cp] = (
                patch.reshape(H * W, Cp).astype(jnp.bfloat16))

    acc = jnp.dot(col_ref[...], w2_ref[...],
                  preferred_element_type=jnp.float32)              # (H*W, Cp) f32

    y2_ref[...] = acc.astype(y2_ref.dtype).reshape(1, H, W, Cp)
    s2_ref[...] = jnp.sum(acc, axis=0, keepdims=True).reshape(1, 1, Cp)
    ss2_ref[...] = jnp.sum(acc * acc, axis=0, keepdims=True).reshape(1, 1, Cp)


# --------------------------------------------------------------------------
# kernel C: bn2-affine + residual add + relu (lane-dense, whole-image tiles)
# --------------------------------------------------------------------------
def _bn2_res_relu_kernel(y2_ref, x_ref, sc2_ref, sh2_ref, o_ref):
    out = (y2_ref[...].astype(jnp.float32) * sc2_ref[...] + sh2_ref[...]
           + x_ref[...].astype(jnp.float32))
    o_ref[...] = jnp.maximum(out, 0.0)


# --------------------------------------------------------------------------
# wrapper
# --------------------------------------------------------------------------
def _fold_bn(gamma, beta, s, ss, count):
    """Fold batch statistics (sum, sum-of-squares) into scale/shift (f32)."""
    mean = jnp.sum(s, axis=(0, 1)) / count                     # (Cp,)
    var = jnp.sum(ss, axis=(0, 1)) / count - mean * mean       # biased variance
    scale = gamma * jax.lax.rsqrt(var + EPS)
    shift = beta - mean * scale
    return scale.reshape(1, 1, -1), shift.reshape(1, 1, -1)


def basic_block(x_nchw, w1_oihw, w2_oihw, g1, b1, g2, b2):
    """Fused BasicBlock forward (stride=1, no downsample). NCHW in/out."""
    N, C, H, W = x_nchw.shape
    Cout = w1_oihw.shape[0]
    assert Cout == C, "default BasicBlock (no downsample) needs inplanes == planes"
    Cp = max(LANE, -(-C // LANE) * LANE)       # channels padded to lane width

    # ---- wrapper-side layout plumbing (transpose / pad / cast only) ----
    x = jnp.transpose(x_nchw, (0, 2, 3, 1)).astype(jnp.float32)        # NHWC
    x_cp = jnp.pad(x, ((0, 0), (0, 0), (0, 0), (0, Cp - C)))           # (N,H,W,Cp) f32
    xp = jnp.pad(x_cp, ((0, 0), (1, 1), (1, 1), (0, 0)))               # (N,H+2,W+2,Cp) f32
    x_res = x_cp.astype(jnp.bfloat16)                                  # residual, bf16

    def pack_w(w_oihw):
        w = jnp.transpose(w_oihw, (2, 3, 1, 0)).astype(jnp.float32)    # (3,3,Ci,Co)
        w = jnp.pad(w, ((0, 0), (0, 0), (0, Cp - C), (0, Cp - Cout)))
        return w.reshape(9 * Cp, Cp).astype(jnp.bfloat16)              # im2col weights

    def pack_p(p):                                                     # gamma / beta
        return jnp.pad(p.astype(jnp.float32), (0, Cp - C))             # (Cp,)

    w1, w2 = pack_w(w1_oihw), pack_w(w2_oihw)
    g1p, b1p, g2p, b2p = (pack_p(p) for p in (g1, b1, g2, b2))

    count = N * H * W
    cp_batch = pltpu.CompilerParams(dimension_semantics=("parallel",),
                                    vmem_limit_bytes=VMEM_LIMIT)

    # ---- kernel A: conv1 + partial BN1 stats ----
    y1, s1, ss1 = pl.pallas_call(
        _conv1_kernel,
        out_shape=(jax.ShapeDtypeStruct((N, H, W, Cp), jnp.bfloat16),
                   jax.ShapeDtypeStruct((N, 1, Cp), jnp.float32),
                   jax.ShapeDtypeStruct((N, 1, Cp), jnp.float32)),
        grid=(N,),
        in_specs=[pl.BlockSpec((1, H + 2, W + 2, Cp), lambda n: (n, 0, 0, 0)),
                  pl.BlockSpec((9 * Cp, Cp), lambda n: (0, 0))],
        out_specs=(pl.BlockSpec((1, H, W, Cp), lambda n: (n, 0, 0, 0)),
                   pl.BlockSpec((1, 1, Cp), lambda n: (n, 0, 0)),
                   pl.BlockSpec((1, 1, Cp), lambda n: (n, 0, 0))),
        scratch_shapes=[pltpu.VMEM((H * W, 9 * Cp), jnp.bfloat16)],
        compiler_params=cp_batch,
    )(xp, w1)

    sc1, sh1 = _fold_bn(g1p, b1p, s1, ss1, count)

    # ---- kernel B: bn1 + relu + conv2 + partial BN2 stats ----
    y2, s2, ss2 = pl.pallas_call(
        _conv2_kernel,
        out_shape=(jax.ShapeDtypeStruct((N, H, W, Cp), jnp.bfloat16),
                   jax.ShapeDtypeStruct((N, 1, Cp), jnp.float32),
                   jax.ShapeDtypeStruct((N, 1, Cp), jnp.float32)),
        grid=(N,),
        in_specs=[pl.BlockSpec((1, H, W, Cp), lambda n: (n, 0, 0, 0)),
                  pl.BlockSpec((9 * Cp, Cp), lambda n: (0, 0)),
                  pl.BlockSpec((1, 1, Cp), lambda n: (0, 0, 0)),
                  pl.BlockSpec((1, 1, Cp), lambda n: (0, 0, 0))],
        out_specs=(pl.BlockSpec((1, H, W, Cp), lambda n: (n, 0, 0, 0)),
                   pl.BlockSpec((1, 1, Cp), lambda n: (n, 0, 0)),
                   pl.BlockSpec((1, 1, Cp), lambda n: (n, 0, 0))),
        scratch_shapes=[pltpu.VMEM((H + 2, W + 2, Cp), jnp.float32),
                        pltpu.VMEM((H * W, 9 * Cp), jnp.bfloat16)],
        compiler_params=cp_batch,
    )(y1, w2, sc1, sh1)

    sc2, sh2 = _fold_bn(g2p, b2p, s2, ss2, count)

    # ---- kernel C: bn2 + residual + relu (whole-image blocks) ----
    out_p = pl.pallas_call(
        _bn2_res_relu_kernel,
        out_shape=jax.ShapeDtypeStruct((N, H, W, Cp), jnp.float32),
        grid=(N,),
        in_specs=[pl.BlockSpec((1, H, W, Cp), lambda n: (n, 0, 0, 0)),
                  pl.BlockSpec((1, H, W, Cp), lambda n: (n, 0, 0, 0)),
                  pl.BlockSpec((1, 1, Cp), lambda n: (0, 0, 0)),
                  pl.BlockSpec((1, 1, Cp), lambda n: (0, 0, 0))],
        out_specs=pl.BlockSpec((1, H, W, Cp), lambda n: (n, 0, 0, 0)),
        compiler_params=cp_batch,
    )(y2, x_res, sc2, sh2)

    out = out_p[..., :C]                        # drop channel padding
    return jnp.transpose(out, (0, 3, 1, 2))     # NHWC -> NCHW


# --------------------------------------------------------------------------
# plain-JAX reference (mirrors the PyTorch forward, f32 end to end)
# --------------------------------------------------------------------------
def basic_block_reference(x, w1, w2, g1, b1, g2, b2):
    def conv3x3(x, w):
        return jax.lax.conv_general_dilated(
            x, w, window_strides=(1, 1), padding=((1, 1), (1, 1)),
            dimension_numbers=("NCHW", "OIHW", "NCHW"))

    def bn(x, g, b):
        m = jnp.mean(x, axis=(0, 2, 3), keepdims=True)
        v = jnp.mean((x - m) ** 2, axis=(0, 2, 3), keepdims=True)
        return (x - m) * jax.lax.rsqrt(v + EPS) * g.reshape(1, -1, 1, 1) \
            + b.reshape(1, -1, 1, 1)

    out = jax.nn.relu(bn(conv3x3(x, w1), g1, b1))
    out = bn(conv3x3(out, w2), g2, b2)
    return jax.nn.relu(out + x)


if __name__ == "__main__":
    key = jax.random.PRNGKey(0)
    k_x, k_w1, k_w2, k_g1, k_b1, k_g2, k_b2 = jax.random.split(key, 7)

    N, C, H, W = 2, 4, 16, 16          # inplanes = planes = 4, stride = 1
    x = jax.random.normal(k_x, (N, C, H, W), jnp.float32)
    w1 = jax.random.normal(k_w1, (C, C, 3, 3), jnp.float32) * 0.1   # conv1 (OIHW)
    w2 = jax.random.normal(k_w2, (C, C, 3, 3), jnp.float32) * 0.1   # conv2 (OIHW)
    g1 = 1.0 + 0.1 * jax.random.normal(k_g1, (C,), jnp.float32)     # bn1 gamma
    b1 = 0.1 * jax.random.normal(k_b1, (C,), jnp.float32)           # bn1 beta
    g2 = 1.0 + 0.1 * jax.random.normal(k_g2, (C,), jnp.float32)     # bn2 gamma
    b2 = 0.1 * jax.random.normal(k_b2, (C,), jnp.float32)           # bn2 beta

    out = jax.block_until_ready(basic_block(x, w1, w2, g1, b1, g2, b2))
    ref = jax.block_until_ready(basic_block_reference(x, w1, w2, g1, b1, g2, b2))

    assert out.shape == (N, C, H, W)
    # Tolerance covers the deliberate bf16 MXU inputs and bf16 inter-kernel
    # activations (f32 accumulation, f32 BN statistics); the reference is f32.
    assert jnp.allclose(out, ref, rtol=2e-2, atol=2e-2), \
        f"max abs err = {jnp.max(jnp.abs(out - ref))}"
    print("KERNEL_OK")
</pallas_src>

<mosaic_0001>
module attributes {stable_mosaic.version = 11 : i64} {
  func.func @_conv1_kernel(%arg0: i32, %arg1: memref<1x18x18x128xf32, #tpu.memory_space<vmem>>, %arg2: memref<1152x128xbf16, #tpu.memory_space<vmem>>, %arg3: memref<1x16x16x128xbf16, #tpu.memory_space<vmem>>, %arg4: memref<1x1x128xf32, #tpu.memory_space<vmem>>, %arg5: memref<1x1x128xf32, #tpu.memory_space<vmem>>, %arg6: memref<256x1152xbf16, #tpu.memory_space<vmem>>) attributes {dimension_semantics = [#tpu.dimension_semantics<parallel>], iteration_bounds = array<i64: 2>, scalar_prefetch = 0 : i64, scratch_operands = 1 : i64, tpu.core_type = #tpu.core_type<tc>, window_params = [{transform_indices = @transform_0, window_bounds = array<i64: 1, 18, 18, 128>}, {pipeline_mode = #tpu.pipeline_mode<synchronous>, transform_indices = @transform_1, window_bounds = array<i64: 1152, 128>}, {transform_indices = @transform_2, window_bounds = array<i64: 1, 16, 16, 128>}, {transform_indices = @transform_3, window_bounds = array<i64: 1, 1, 128>}, {transform_indices = @transform_4, window_bounds = array<i64: 1, 1, 128>}]} {
    %c0 = arith.constant 0 : index
    %c0_0 = arith.constant 0 : index
    %c0_1 = arith.constant 0 : index
    %c0_2 = arith.constant 0 : index
    %0 = vector.load %arg1[%c0, %c0_0, %c0_1, %c0_2] : memref<1x18x18x128xf32, #tpu.memory_space<vmem>>, vector<1x16x16x128xf32>
    %1 = vector.shape_cast %0 : vector<1x16x16x128xf32> to vector<16x16x128xf32>
    %2 = vector.shape_cast %1 : vector<16x16x128xf32> to vector<256x128xf32>
    %3 = arith.truncf %2 : vector<256x128xf32> to vector<256x128xbf16>
    %c0_3 = arith.constant 0 : index
    %c0_4 = arith.constant 0 : index
    %4 = vector.load %arg6[%c0_3, %c0_4] : memref<256x1152xbf16, #tpu.memory_space<vmem>>, vector<256x128xbf16>
    tpu.vector_store %arg6[%c0_3, %c0_4], %3 {strides = array<i32>} : memref<256x1152xbf16, #tpu.memory_space<vmem>>, vector<256x128xbf16>,
    %c0_5 = arith.constant 0 : index
    %c0_6 = arith.constant 0 : index
    %c1 = arith.constant 1 : index
    %c0_7 = arith.constant 0 : index
    %5 = vector.load %arg1[%c0_5, %c0_6, %c1, %c0_7] : memref<1x18x18x128xf32, #tpu.memory_space<vmem>>, vector<1x16x16x128xf32>
    %6 = vector.shape_cast %5 : vector<1x16x16x128xf32> to vector<16x16x128xf32>
    %7 = vector.shape_cast %6 : vector<16x16x128xf32> to vector<256x128xf32>
    %8 = arith.truncf %7 : vector<256x128xf32> to vector<256x128xbf16>
    %c0_8 = arith.constant 0 : index
    %c128 = arith.constant 128 : index
    %9 = vector.load %arg6[%c0_8, %c128] : memref<256x1152xbf16, #tpu.memory_space<vmem>>, vector<256x128xbf16>
    tpu.vector_store %arg6[%c0_8, %c128], %8 {strides = array<i32>} : memref<256x1152xbf16, #tpu.memory_space<vmem>>, vector<256x128xbf16>,
    %c0_9 = arith.constant 0 : index
    %c0_10 = arith.constant 0 : index
    %c2 = arith.constant 2 : index
    %c0_11 = arith.constant 0 : index
    %10 = vector.load %arg1[%c0_9, %c0_10, %c2, %c0_11] : memref<1x18x18x128xf32, #tpu.memory_space<vmem>>, vector<1x16x16x128xf32>
    %11 = vector.shape_cast %10 : vector<1x16x16x128xf32> to vector<16x16x128xf32>
    %12 = vector.shape_cast %11 : vector<16x16x128xf32> to vector<256x128xf32>
    %13 = arith.truncf %12 : vector<256x128xf32> to vector<256x128xbf16>
    %c0_12 = arith.constant 0 : index
    %c256 = arith.constant 256 : index
    %14 = vector.load %arg6[%c0_12, %c256] : memref<256x1152xbf16, #tpu.memory_space<vmem>>, vector<256x128xbf16>
    tpu.vector_store %arg6[%c0_12, %c256], %13 {strides = array<i32>} : memref<256x1152xbf16, #tpu.memory_space<vmem>>, vector<256x128xbf16>,
    %c0_13 = arith.constant 0 : index
    %c1_14 = arith.constant 1 : index
    %c0_15 = arith.constant 0 : index
    %c0_16 = arith.constant 0 : index
    %15 = vector.load %arg1[%c0_13, %c1_14, %c0_15, %c0_16] : memref<1x18x18x128xf32, #tpu.memory_space<vmem>>, vector<1x16x16x128xf32>
    %16 = vector.shape_cast %15 : vector<1x16x16x128xf32> to vector<16x16x128xf32>
    %17 = vector.shape_cast %16 : vector<16x16x128xf32> to vector<256x128xf32>
    %18 = arith.truncf %17 : vector<256x128xf32> to vector<256x128xbf16>
    %c0_17 = arith.constant 0 : index
    %c384 = arith.constant 384 : index
    %19 = vector.load %arg6[%c0_17, %c384] : memref<256x1152xbf16, #tpu.memory_space<vmem>>, vector<256x128xbf16>
    tpu.vector_store %arg6[%c0_17, %c384], %18 {strides = array<i32>} : memref<256x1152xbf16, #tpu.memory_space<vmem>>, vector<256x128xbf16>,
    %c0_18 = arith.constant 0 : index
    %c1_19 = arith.constant 1 : index
    %c1_20 = arith.constant 1 : index
    %c0_21 = arith.constant 0 : index
    %20 = vector.load %arg1[%c0_18, %c1_19, %c1_20, %c0_21] : memref<1x18x18x128xf32, #tpu.memory_space<vmem>>, vector<1x16x16x128xf32>
    %21 = vector.shape_cast %20 : vector<1x16x16x128xf32> to vector<16x16x128xf32>
    %22 = vector.shape_cast %21 : vector<16x16x128xf32> to vector<256x128xf32>
    %23 = arith.truncf %22 : vector<256x128xf32> to vector<256x128xbf16>
    %c0_22 = arith.constant 0 : index
    %c512 = arith.constant 512 : index
    %24 = vector.load %arg6[%c0_22, %c512] : memref<256x1152xbf16, #tpu.memory_space<vmem>>, vector<256x128xbf16>
    tpu.vector_store %arg6[%c0_22, %c512], %23 {strides = array<i32>} : memref<256x1152xbf16, #tpu.memory_space<vmem>>, vector<256x128xbf16>,
    %c0_23 = arith.constant 0 : index
    %c1_24 = arith.constant 1 : index
    %c2_25 = arith.constant 2 : index
    %c0_26 = arith.constant 0 : index
    %25 = vector.load %arg1[%c0_23, %c1_24, %c2_25, %c0_26] : memref<1x18x18x128xf32, #tpu.memory_space<vmem>>, vector<1x16x16x128xf32>
    %26 = vector.shape_cast %25 : vector<1x16x16x128xf32> to vector<16x16x128xf32>
    %27 = vector.shape_cast %26 : vector<16x16x128xf32> to vector<256x128xf32>
    %28 = arith.truncf %27 : vector<256x128xf32> to vector<256x128xbf16>
    %c0_27 = arith.constant 0 : index
    %c640 = arith.constant 640 : index
    %29 = vector.load %arg6[%c0_27, %c640] : memref<256x1152xbf16, #tpu.memory_space<vmem>>, vector<256x128xbf16>
    tpu.vector_store %arg6[%c0_27, %c640], %28 {strides = array<i32>} : memref<256x1152xbf16, #tpu.memory_space<vmem>>, vector<256x128xbf16>,
    %c0_28 = arith.constant 0 : index
    %c2_29 = arith.constant 2 : index
    %c0_30 = arith.constant 0 : index
    %c0_31 = arith.constant 0 : index
    %30 = vector.load %arg1[%c0_28, %c2_29, %c0_30, %c0_31] : memref<1x18x18x128xf32, #tpu.memory_space<vmem>>, vector<1x16x16x128xf32>
    %31 = vector.shape_cast %30 : vector<1x16x16x128xf32> to vector<16x16x128xf32>
    %32 = vector.shape_cast %31 : vector<16x16x128xf32> to vector<256x128xf32>
    %33 = arith.truncf %32 : vector<256x128xf32> to vector<256x128xbf16>
    %c0_32 = arith.constant 0 : index
    %c768 = arith.constant 768 : index
    %34 = vector.load %arg6[%c0_32, %c768] : memref<256x1152xbf16, #tpu.memory_space<vmem>>, vector<256x128xbf16>
    tpu.vector_store %arg6[%c0_32, %c768], %33 {strides = array<i32>} : memref<256x1152xbf16, #tpu.memory_space<vmem>>, vector<256x128xbf16>,
    %c0_33 = arith.constant 0 : index
    %c2_34 = arith.constant 2 : index
    %c1_35 = arith.constant 1 : index
    %c0_36 = arith.constant 0 : index
    %35 = vector.load %arg1[%c0_33, %c2_34, %c1_35, %c0_36] : memref<1x18x18x128xf32, #tpu.memory_space<vmem>>, vector<1x16x16x128xf32>
    %36 = vector.shape_cast %35 : vector<1x16x16x128xf32> to vector<16x16x128xf32>
    %37 = vector.shape_cast %36 : vector<16x16x128xf32> to vector<256x128xf32>
    %38 = arith.truncf %37 : vector<256x128xf32> to vector<256x128xbf16>
    %c0_37 = arith.constant 0 : index
    %c896 = arith.constant 896 : index
    %39 = vector.load %arg6[%c0_37, %c896] : memref<256x1152xbf16, #tpu.memory_space<vmem>>, vector<256x128xbf16>
    tpu.vector_store %arg6[%c0_37, %c896], %38 {strides = array<i32>} : memref<256x1152xbf16, #tpu.memory_space<vmem>>, vector<256x128xbf16>,
    %c0_38 = arith.constant 0 : index
    %c2_39 = arith.constant 2 : index
    %c2_40 = arith.constant 2 : index
    %c0_41 = arith.constant 0 : index
    %40 = vector.load %arg1[%c0_38, %c2_39, %c2_40, %c0_41] : memref<1x18x18x128xf32, #tpu.memory_space<vmem>>, vector<1x16x16x128xf32>
    %41 = vector.shape_cast %40 : vector<1x16x16x128xf32> to vector<16x16x128xf32>
    %42 = vector.shape_cast %41 : vector<16x16x128xf32> to vector<256x128xf32>
    %43 = arith.truncf %42 : vector<256x128xf32> to vector<256x128xbf16>
    %c0_42 = arith.constant 0 : index
    %c1024 = arith.constant 1024 : index
    %44 = vector.load %arg6[%c0_42, %c1024] : memref<256x1152xbf16, #tpu.memory_space<vmem>>, vector<256x128xbf16>
    tpu.vector_store %arg6[%c0_42, %c1024], %43 {strides = array<i32>} : memref<256x1152xbf16, #tpu.memory_space<vmem>>, vector<256x128xbf16>,
    %c0_43 = arith.constant 0 : index
    %c0_44 = arith.constant 0 : index
    %45 = vector.load %arg6[%c0_43, %c0_44] : memref<256x1152xbf16, #tpu.memory_space<vmem>>, vector<256x1152xbf16>
    %c0_45 = arith.constant 0 : index
    %c0_46 = arith.constant 0 : index
    %46 = vector.load %arg2[%c0_45, %c0_46] : memref<1152x128xbf16, #tpu.memory_space<vmem>>, vector<1152x128xbf16>
    %cst = arith.constant dense<0.000000e+00> : vector<256x128xf32>
    %47 = tpu.matmul %45, %46, %cst {dimension_numbers = #tpu.dot_dimension_numbers<[1], [0], [0], [1], [0, 0, 1, 1], [], []>} : vector<256x1152xbf16>, vector<1152x128xbf16>, vector<256x128xf32> -> vector<256x128xf32>
    %48 = arith.truncf %47 : vector<256x128xf32> to vector<256x128xbf16>
    %49 = vector.shape_cast %48 : vector<256x128xbf16> to vector<1x16x16x128xbf16>
    %c0_47 = arith.constant 0 : index
    %c0_48 = arith.constant 0 : index
    %c0_49 = arith.constant 0 : index
    %c0_50 = arith.constant 0 : index
    %50 = vector.load %arg3[%c0_47, %c0_48, %c0_49, %c0_50] : memref<1x16x16x128xbf16, #tpu.memory_space<vmem>>, vector<1x16x16x128xbf16>
    tpu.vector_store %arg3[%c0_47, %c0_48, %c0_49, %c0_50], %49 {strides = array<i32>} : memref<1x16x16x128xbf16, #tpu.memory_space<vmem>>, vector<1x16x16x128xbf16>,
    %cst_51 = arith.constant dense<0.000000e+00> : vector<128xf32>
    %51 = vector.multi_reduction <add>, %47, %cst_51 [0] : vector<256x128xf32> to vector<128xf32>
    %52 = vector.shape_cast %51 : vector<128xf32> to vector<1x128xf32>
    %53 = vector.shape_cast %52 : vector<1x128xf32> to vector<1x1x128xf32>
    %c0_52 = arith.constant 0 : index
    %c0_53 = arith.constant 0 : index
    %c0_54 = arith.constant 0 : index
    %54 = vector.load %arg4[%c0_52, %c0_53, %c0_54] : memref<1x1x128xf32, #tpu.memory_space<vmem>>, vector<1x1x128xf32>
    tpu.vector_store %arg4[%c0_52, %c0_53, %c0_54], %53 {strides = array<i32>} : memref<1x1x128xf32, #tpu.memory_space<vmem>>, vector<1x1x128xf32>,
    %55 = arith.mulf %47, %47 : vector<256x128xf32>
    %cst_55 = arith.constant dense<0.000000e+00> : vector<128xf32>
    %56 = vector.multi_reduction <add>, %55, %cst_55 [0] : vector<256x128xf32> to vector<128xf32>
    %57 = vector.shape_cast %56 : vector<128xf32> to vector<1x128xf32>
    %58 = vector.shape_cast %57 : vector<1x128xf32> to vector<1x1x128xf32>
    %c0_56 = arith.constant 0 : index
    %c0_57 = arith.constant 0 : index
    %c0_58 = arith.constant 0 : index
    %59 = vector.load %arg5[%c0_56, %c0_57, %c0_58] : memref<1x1x128xf32, #tpu.memory_space<vmem>>, vector<1x1x128xf32>
    tpu.vector_store %arg5[%c0_56, %c0_57, %c0_58], %58 {strides = array<i32>} : memref<1x1x128xf32, #tpu.memory_space<vmem>>, vector<1x1x128xf32>,
    return
  }
  func.func @transform_0(%arg0: i32) -> (i32, i32, i32, i32) {
    %c0_i32 = arith.constant 0 : i32
    %c0_i32_0 = arith.constant 0 : i32
    %c0_i32_1 = arith.constant 0 : i32
    %c0_i32_2 = arith.constant 0 : i32
    return %arg0, %c0_i32, %c0_i32_0, %c0_i32_1 : i32, i32, i32, i32
  }
  func.func @transform_1(%arg0: i32) -> (i32, i32) {
    %c0_i32 = arith.constant 0 : i32
    %c0_i32_0 = arith.constant 0 : i32
    %c0_i32_1 = arith.constant 0 : i32
    return %c0_i32, %c0_i32_0 : i32, i32
  }
  func.func @transform_2(%arg0: i32) -> (i32, i32, i32, i32) {
    %c0_i32 = arith.constant 0 : i32
    %c0_i32_0 = arith.constant 0 : i32
    %c0_i32_1 = arith.constant 0 : i32
    %c0_i32_2 = arith.constant 0 : i32
    return %arg0, %c0_i32, %c0_i32_0, %c0_i32_1 : i32, i32, i32, i32
  }
  func.func @transform_3(%arg0: i32) -> (i32, i32, i32) {
    %c0_i32 = arith.constant 0 : i32
    %c0_i32_0 = arith.constant 0 : i32
    %c0_i32_1 = arith.constant 0 : i32
    return %arg0, %c0_i32, %c0_i32_0 : i32, i32, i32
  }
  func.func @transform_4(%arg0: i32) -> (i32, i32, i32) {
    %c0_i32 = arith.constant 0 : i32
    %c0_i32_0 = arith.constant 0 : i32
    %c0_i32_1 = arith.constant 0 : i32
    return %arg0, %c0_i32, %c0_i32_0 : i32, i32, i32
  }
}

</mosaic_0001>

<bundles_post_ra>
// kernel: tpu_custom_call.1
= control target key start
LH: loop header
LB: loop body
LE: loop exit
PB: predicated region body
PF: predicated region fallthrough
CT: control target
= control target key end

     0   :  { %10 = vsyncpa [#allocation4], 0  ;;  %s5115_s0 = inlined_call_operand.vmem [shape: f32[2,18,18,128], index: 0, kind: input, shape index: {}]   ;;  %s5116_s1 = inlined_call_operand.vmem [shape: bf16[1152,128], index: 1, kind: input, shape index: {}]   ;;  %s5117_s2 = inlined_call_operand.hbm [shape: bf16[2,16,16,128], index: 2, kind: output, shape index: {0}]   ;;  %s5118_s3 = inlined_call_operand.hbm [shape: f32[2,1,128], index: 3, kind: output, shape index: {1}]   ;;  %s5119_s4 = inlined_call_operand.hbm [shape: f32[2,1,128], index: 4, kind: output, shape index: {2}]  }
   0x1   :  { %12 = vsyncpa [#allocation4 + $0x1], 0 }
   0x2   :  { %13 = vsyncpa [#allocation6], 0 }
   0x3   :  { %15 = vsyncpa [#allocation6 + $0x1], 0  ;;  %s3998_s15 = smov 0   ;;  %s4000_s16 = smov 0  }
   0x4   :  { %s4002_s17 = smov 0   ;;  %s4004_s18 = smov 0  }
   0x5 LB: > { %s4019_s19 = sadd.s32 4294967295, %s3966_s18   ;;  %s2747_s20 = sadd.s32 4294967294, %s3966_s18   ;;  %s3966_s18 = sphi %s4004_s18, %s5125_s18   ;;  %s3962_s17 = sphi %s4002_s17, %s5124_s17   ;;  %s3958_s16 = sphi %s4000_s16, %s5123_s16   ;;  %s3954_s15 = sphi %s3998_s15, %s5122_s15  }
   0x6   : > { %s4023_s21 = sadd.s32 1, %s3966_s18   ;;  %s75_s22 = sadd.s32 1, %s3962_s17 }
   0x7   : > { %s72_s23 = ssub.s32 %s3966_s18, %s4023_s21  ;;  %p85_p0 = scmp.ne.s32.totalorder %s3962_s17, %s3958_s16 }
   0x8   : > { %p73_p1 = scmp.eq.s32.totalorder %s72_s23, 0  ;;  %p86_p2 = scmp.eq.s32.totalorder %s4019_s19, 1 }
   0x9   : > { %p91_p3 = scmp.ne.s32.totalorder %s3958_s16, %s3954_s15  ;;  %p92_p4 = scmp.eq.s32.totalorder %s2747_s20, 1 }
   0xa   : > { %s4036_s24 = scalar_select %p73_p1, %s3962_s17, %s75_s22  }
   0xb   : > { %p4038_p5 = por %p86_p2, %p85_p0  ;;  %p4042_p6 = por %p92_p4, %p91_p3 }
   0xc   : > { %p2750_p7 = scmp.ge.s32.totalorder %s3966_s18, 1  ;;  %p173_p8 = scmp.lt.s32.totalorder %s3966_s18, 3 }
   0xe   : > { %p174_p9 = pnand %p2750_p7, %p173_p8 }
   0xf   : > { %v3772_v0 = vld [vmem:[%s5116_s1 + $0x40] sm:$0xff] (!%p174_p9)   ;;  %p207_p10 = scmp.lt.s32.totalorder (!%p174_p9), %s4019_s19, 1  ;;  %v3774_v2 = vld [vmem:[%s5116_s1 + $0x48] sm:$0xff] (!%p174_p9)   ;;  %v3776_v4 = vld [vmem:[%s5116_s1 + $0x50] sm:$0xff] (!%p174_p9)   ;;  %s3968_s8 = smov (!%p174_p9), [#allocation3]  }
  0x10   : > { %177 = sbr.rel (%p174_p9) target bundleno = 616 (0x268), region = 28  ;;  %v3773_v1 = vld [vmem:[%s5116_s1] sm:$0xff] (!%p174_p9)   ;;  %3184 = vmatprep.subr.bf16.mxu0 (!%p174_p9), %v3772_v0  ;;  %3704 = vmatprep.subr.bf16.mxu1 (!%p174_p9), %v3772_v0  ;;  %v3775_v3 = vld [vmem:[%s5116_s1 + $0x8] sm:$0xff] (!%p174_p9)   ;;  %v3777_v5 = vld [vmem:[%s5116_s1 + $0x10] sm:$0xff] (!%p174_p9)   ;;  %s3848_s9 = sshll.u32 (!%p174_p9), %s3968_s8, 4  ;;  %s3849_s9 = int_to_ptr.vmem [resolvable:$false] %s3848_s9 }
  0x11   : > { %3185 = vmatpush3.bf16.msra.mxu0 (!%p174_p9), %v3773_v1  ;;  %3712 = vmatpush3.bf16.msra.mxu1 (!%p174_p9), %v3773_v1  ;;  %v3778_v6 = vld [vmem:[%s5116_s1 + $0x58] sm:$0xff] (!%p174_p9)   ;;  %v3780_v8 = vld [vmem:[%s5116_s1 + $0x60] sm:$0xff] (!%p174_p9)   ;;  %v3782_v10 = vld [vmem:[%s5116_s1 + $0x68] sm:$0xff] (!%p174_p9)   ;;  %s3850_s10 = scalar_lea.vmem (!%p174_p9), %s3849_s9, 4096 }
  0x12   : > { %3186 = vmatprep.subr.bf16.mxu0 (!%p174_p9), %v3774_v2  ;;  %3705 = vmatprep.subr.bf16.mxu1 (!%p174_p9), %v3774_v2  ;;  %v3779_v7 = vld [vmem:[%s5116_s1 + $0x18] sm:$0xff] (!%p174_p9)   ;;  %v3781_v9 = vld [vmem:[%s5116_s1 + $0x20] sm:$0xff] (!%p174_p9)   ;;  %v3783_v17 = vld [vmem:[%s5116_s1 + $0x28] sm:$0xff] (!%p174_p9)  }
  0x13   : > { %v3784_v18 = vld [vmem:[%s5116_s1 + $0x70] sm:$0xff] (!%p174_p9)   ;;  %v3786_v20 = vld [vmem:[%s5116_s1 + $0x78] sm:$0xff] (!%p174_p9)   ;;  %v3788_v26 = vld [vmem:[%s5116_s1 + $0xc0] sm:$0xff] (!%p174_p9)  }
  0x14   : > { %v3785_v19 = vld [vmem:[%s5116_s1 + $0x30] sm:$0xff] (!%p174_p9)   ;;  %v3787_v21 = vld [vmem:[%s5116_s1 + $0x38] sm:$0xff] (!%p174_p9)   ;;  %v3789_v27 = vld [vmem:[%s5116_s1 + $0x140] sm:$0xff] (!%p174_p9)  }
  0x15   : > { %3187 = vmatpush3.bf16.msra.mxu0 (!%p174_p9), %v3775_v3  ;;  %3713 = vmatpush3.bf16.msra.mxu1 (!%p174_p9), %v3775_v3  ;;  %v3790_v30 = vld [vmem:[%s5116_s1 + $0x80] sm:$0xff] (!%p174_p9)   ;;  %v3792_v36 = vld [vmem:[%s5116_s1 + $0xc8] sm:$0xff] (!%p174_p9)   ;;  %v3794_v45 = vld [vmem:[%s5116_s1 + $0xd0] sm:$0xff] (!%p174_p9)  }
  0x16   : > { %3188 = vmatprep.subr.bf16.mxu0 (!%p174_p9), %v3776_v4  ;;  %3706 = vmatprep.subr.bf16.mxu1 (!%p174_p9), %v3776_v4  ;;  %v3791_v35 = vld [vmem:[%s5116_s1 + $0x100] sm:$0xff] (!%p174_p9)   ;;  %v3793_v38 = vld [vmem:[%s5116_s1 + $0x88] sm:$0xff] (!%p174_p9)   ;;  %v3795_v53 = vld [vmem:[%s5116_s1 + $0x90] sm:$0xff] (!%p174_p9)  }
  0x17   : > { %s208_s11 = scalar_select %p207_p10, %s4019_s19, 1  ;;  %v3797_v42 = vld [vmem:[%s5116_s1 + $0x148] sm:$0xff]   ;;  %v3796_v55 = vld [vmem:[%s5116_s1 + $0xd8] sm:$0xff]   ;;  %v3800_v62 = vld [vmem:[%s5116_s1 + $0xe0] sm:$0xff]  }
  0x18   : > { %v3799_v46 = vld [vmem:[%s5116_s1 + $0x108] sm:$0xff]   ;;  %v3798_v57 = vld [vmem:[%s5116_s1 + $0x98] sm:$0xff]   ;;  %v3805_v2 = vld [vmem:[%s5116_s1 + $0x150] sm:$0xff]  }
  0x19   : > { %s3720_s23 = smul.u32 432, %s208_s11  ;;  %3189 = vmatpush3.bf16.msra.mxu0 %v3777_v5  ;;  %3714 = vmatpush3.bf16.msra.mxu1 %v3777_v5 }
  0x1a   : > { %3190 = vmatprep.subr.bf16.mxu0 %v3778_v6  ;;  %3707 = vmatprep.subr.bf16.mxu1 %v3778_v6  ;;  %v3807_v6 = vld [vmem:[%s5116_s1 + $0x110] sm:$0xff]  }
  0x1b   : > { %s4080_s7 = scalar_lea.vmem %s5115_s0, %s3720_s23  ;;  %s3088_s23 = sshll.u32 %s4019_s19, 11 }
  0x1c   : > { %v277_v11 = vld [vmem:[%s4080_s7 + $0x1] sm:$0xff]  ;;  %v278_v12 = vld [vmem:[%s4080_s7 + $0x9] sm:$0xff]  ;;  %v279_v28 = vld [vmem:[%s4080_s7 + $0x19] sm:$0xff]  ;;  %s4999_s30 = scalar_lea.hbm %s5117_s2, %s3088_s23 }
  0x1d   : > { %3191 = vmatpush3.bf16.msra.mxu0 %v3779_v7  ;;  %3715 = vmatpush3.bf16.msra.mxu1 %v3779_v7  ;;  %v301_v13 = vld [vmem:[%s4080_s7 + $0x121] sm:$0xff]  ;;  %v309_v14 = vpack.c.bf16 %v278_v12, %v277_v11  ;;  %v302_v15 = vld [vmem:[%s4080_s7 + $0x129] sm:$0xff]  ;;  %v303_v31 = vld [vmem:[%s4080_s7 + $0x139] sm:$0xff] }
  0x1e   : > { %3192 = vmatprep.subr.bf16.mxu0 %v3780_v8  ;;  %3708 = vmatprep.subr.bf16.mxu1 %v3780_v8  ;;  %v321_v16 = vpack.c.bf16 %v302_v15, %v301_v13  ;;  %v213_v22 = vld [vmem:[%s4080_s7] sm:$0xff]  ;;  %v214_v23 = vld [vmem:[%s4080_s7 + $0x8] sm:$0xff]  ;;  %v215_v40 = vld [vmem:[%s4080_s7 + $0x18] sm:$0xff] }
  0x1f   : > { %1543 = vmatprep.mubr.bf16.mxu0 %v309_v14  ;;  %v237_v24 = vld [vmem:[%s4080_s7 + $0x120] sm:$0xff]  ;;  %v238_v25 = vld [vmem:[%s4080_s7 + $0x128] sm:$0xff]  ;;  %v245_v32 = vpack.c.bf16 %v214_v23, %v213_v22  ;;  %v239_v43 = vld [vmem:[%s4080_s7 + $0x138] sm:$0xff] }
  0x20   : > { %1639 = vmatprep.mubr.bf16.mxu1 %v321_v16  ;;  %v280_v29 = vld [vmem:[%s4080_s7 + $0x21] sm:$0xff]  ;;  %v4123_v33 = vpack.c.bf16 %v238_v25, %v237_v24  ;;  %v281_v47 = vld [vmem:[%s4080_s7 + $0x31] sm:$0xff]  ;;  %v282_v48 = vld [vmem:[%s4080_s7 + $0x39] sm:$0xff] }
  0x21   : > { %3193 = vmatpush3.bf16.msra.mxu0 %v3781_v9  ;;  %3716 = vmatpush3.bf16.msra.mxu1 %v3781_v9  ;;  %v304_v34 = vld [vmem:[%s4080_s7 + $0x141] sm:$0xff]  ;;  %v4132_v37 = vpack.c.bf16 %v280_v29, %v279_v28  ;;  %v305_v49 = vld [vmem:[%s4080_s7 + $0x151] sm:$0xff]  ;;  %v306_v50 = vld [vmem:[%s4080_s7 + $0x159] sm:$0xff]  ;;  %v4163_v54 = vpack.c.bf16 %v282_v48, %v281_v47 }
  0x22   : > { %3194 = vmatprep.subr.bf16.mxu0 %v3782_v10  ;;  %3709 = vmatprep.subr.bf16.mxu1 %v3782_v10  ;;  %v322_v39 = vpack.c.bf16 %v304_v34, %v303_v31  ;;  %v216_v41 = vld [vmem:[%s4080_s7 + $0x20] sm:$0xff]  ;;  %v323_v56 = vpack.c.bf16 %v306_v50, %v305_v49  ;;  %v217_v58 = vld [vmem:[%s4080_s7 + $0x30] sm:$0xff]  ;;  %v218_v59 = vld [vmem:[%s4080_s7 + $0x38] sm:$0xff] }
  0x23   : > { %v240_v44 = vld [vmem:[%s4080_s7 + $0x140] sm:$0xff]  ;;  %v4156_v51 = vpack.c.bf16 %v216_v41, %v215_v40  ;;  %v241_v60 = vld [vmem:[%s4080_s7 + $0x150] sm:$0xff]  ;;  %v242_v61 = vld [vmem:[%s4080_s7 + $0x158] sm:$0xff]  ;;  %v4188_v4 = vpack.c.bf16 %v218_v59, %v217_v58 }
  0x24   : > { %v4158_v52 = vpack.c.bf16 %v240_v44, %v239_v43  ;;  %v283_v63 = vld [vmem:[%s4080_s7 + $0x49] sm:$0xff]  ;;  %v284_v0 = vld [vmem:[%s4080_s7 + $0x51] sm:$0xff]  ;;  %v4190_v5 = vpack.c.bf16 %v242_v61, %v241_v60  ;;  %v3801_v7 = vld [vmem:[%s5116_s1 + $0xa0] sm:$0xff]  }
  0x25   : > { %3195 = vmatpush3.bf16.msra.mxu0 %v3783_v17  ;;  %3717 = vmatpush3.bf16.msra.mxu1 %v3783_v17  ;;  %v307_v1 = vld [vmem:[%s4080_s7 + $0x169] sm:$0xff]  ;;  %v308_v3 = vld [vmem:[%s4080_s7 + $0x171] sm:$0xff]  ;;  %v4198_v8 = vpack.c.bf16 %v284_v0, %v283_v63  ;;  %v285_v17 = vld [vmem:[%s4080_s7 + $0x61] sm:$0xff] }
  0x26   : > { %3196 = vmatprep.subr.bf16.mxu0 %v3784_v18  ;;  %3710 = vmatprep.subr.bf16.mxu1 %v3784_v18  ;;  %v3802_v9 = vld [vmem:[%s5116_s1 + $0xe8] sm:$0xff]   ;;  %v324_v10 = vpack.c.bf16 %v308_v3, %v307_v1  ;;  %v220_v13 = vld [vmem:[%s4080_s7 + $0x50] sm:$0xff]  ;;  %v3813_v22 = vld [vmem:[%s5116_s1 + $0x118] sm:$0xff]  }
  0x27   : > { %v3803_v11 = vld [vmem:[%s5116_s1 + $0xa8] sm:$0xff]   ;;  %v244_v15 = vld [vmem:[%s4080_s7 + $0x170] sm:$0xff]  ;;  %v3808_v25 = vld [vmem:[%s5116_s1 + $0xf8] sm:$0xff]  }
  0x28   : > { %v219_v12 = vld [vmem:[%s4080_s7 + $0x48] sm:$0xff]  ;;  %v3804_v16 = vld [vmem:[%s5116_s1 + $0xf0] sm:$0xff]   ;;  %v3810_v31 = vld [vmem:[%s5116_s1 + $0x1c0] sm:$0xff]  }
  0x29   : > { %3197 = vmatpush3.bf16.msra.mxu0 %v3785_v19  ;;  %3718 = vmatpush3.bf16.msra.mxu1 %v3785_v19  ;;  %v243_v14 = vld [vmem:[%s4080_s7 + $0x168] sm:$0xff]  ;;  %v3812_v19 = vld [vmem:[%s5116_s1 + $0x158] sm:$0xff]   ;;  %v3806_v23 = vld [vmem:[%s5116_s1 + $0xb0] sm:$0xff]  }
  0x2a   : > { %3198 = vmatprep.subr.bf16.mxu0 %v3786_v20  ;;  %3711 = vmatprep.subr.bf16.mxu1 %v3786_v20  ;;  %v286_v18 = vld [vmem:[%s4080_s7 + $0x69] sm:$0xff]  ;;  %v4221_v20 = vpack.c.bf16 %v220_v13, %v219_v12  ;;  %v3814_v34 = vld [vmem:[%s5116_s1 + $0x160] sm:$0xff]   ;;  %v223_v43 = vld [vmem:[%s4080_s7 + $0x78] sm:$0xff] }
  0x2b   : > { %v4231_v24 = vpack.c.bf16 %v286_v18, %v285_v17  ;;  %v222_v28 = vld [vmem:[%s4080_s7 + $0x68] sm:$0xff]  ;;  %v3811_v40 = vld [vmem:[%s5116_s1 + $0x180] sm:$0xff]   ;;  %v289_v50 = vld [vmem:[%s4080_s7 + $0x91] sm:$0xff] }
  0x2c   : > { %v341_v29 = vld [vmem:[%s4080_s7 + $0x2] sm:$0xff]  ;;  %v343_v47 = vld [vmem:[%s4080_s7 + $0x1a] sm:$0xff]  ;;  %v3821_v58 = vld [vmem:[%s5116_s1 + $0x190] sm:$0xff]  }
  0x2d   : > { %3199 = vmatpush3.bf16.msra.mxu0 %v3787_v21  ;;  %3719 = vmatpush3.bf16.msra.mxu1 %v3787_v21  ;;  %v4223_v21 = vpack.c.bf16 %v244_v15, %v243_v14  ;;  %v3818_v44 = vld [vmem:[%s5116_s1 + $0x168] sm:$0xff]   ;;  %v3822_v59 = vld [vmem:[%s5116_s1 + $0x170] sm:$0xff]   ;;  %v346_v0 = vld [vmem:[%s4080_s7 + $0x3a] sm:$0xff] }
  0x2e   : > { %3296 = vmatprep.subr.bf16.mxu1 %v3788_v26  ;;  %3408 = vmatprep.subr.bf16.mxu0 %v3789_v27  ;;  %v3809_v26 = vld [vmem:[%s5116_s1 + $0xb8] sm:$0xff]   ;;  %v221_v27 = vld [vmem:[%s4080_s7 + $0x60] sm:$0xff]  ;;  %v3817_v49 = vld [vmem:[%s5116_s1 + $0x188] sm:$0xff]  }
  0x2f   : > { %v344_v48 = vld [vmem:[%s4080_s7 + $0x22] sm:$0xff]  ;;  %v225_v60 = vld [vmem:[%s4080_s7 + $0x90] sm:$0xff]  ;;  %v3824_v3 = vld [vmem:[%s5116_s1 + $0x1d8] sm:$0xff]  }
  0x30   : > { %1544 = vmatmul.mubr.bf16.vlgmr.msra.gmra.mrb[0].mxu0 %v245_v32  ;;  %1640 = vmatmul.mubr.bf16.vlgmr.msra.gmra.mrb[0].mxu1 %v4123_v33  ;;  %v287_v32 = vld [vmem:[%s4080_s7 + $0x79] sm:$0xff]  ;;  %v3823_v61 = vld [vmem:[%s5116_s1 + $0x130] sm:$0xff]   ;;  %v227_v13 = vld [vmem:[%s4080_s7 + $0xa8] sm:$0xff] }
  0x31   : > { %3297 = vmatpush3.bf16.msra.mxu1 %v3790_v30  ;;  %3409 = vmatpush3.bf16.msra.mxu0 %v3791_v35  ;;  %v342_v30 = vld [vmem:[%s4080_s7 + $0xa] sm:$0xff]  ;;  %v288_v35 = vld [vmem:[%s4080_s7 + $0x81] sm:$0xff]  ;;  %v345_v63 = vld [vmem:[%s4080_s7 + $0x32] sm:$0xff] }
  0x32   : > { %3298 = vmatprep.subr.bf16.mxu1 %v3792_v36  ;;  %1551 = vmatprep.mubr.bf16.mxu0 %v4132_v37  ;;  %v3816_v36 = vld [vmem:[%s5116_s1 + $0x120] sm:$0xff]   ;;  %v4263_v41 = vpack.c.bf16 %v288_v35, %v287_v32  ;;  %v291_v1 = vld [vmem:[%s4080_s7 + $0xa9] sm:$0xff]  ;;  %v3827_v12 = vld [vmem:[%s5116_s1 + $0x138] sm:$0xff]  }
  0x33   : > { %1647 = vmatprep.mubr.bf16.mxu1 %v322_v39  ;;  %3410 = vmatprep.subr.bf16.mxu0 %v3797_v42  ;;  %v373_v39 = vpack.c.bf16 %v342_v30, %v341_v29  ;;  %v3815_v42 = vld [vmem:[%s5116_s1 + $0x1c8] sm:$0xff]   ;;  %v228_v14 = vld [vmem:[%s4080_s7 + $0xb0] sm:$0xff]  ;;  %v229_v29 = vld [vmem:[%s4080_s7 + $0xc0] sm:$0xff] }
  0x34   : > { %v347_v15 = vld [vmem:[%s4080_s7 + $0x4a] sm:$0xff]  ;;  %v293_v17 = vld [vmem:[%s4080_s7 + $0xc1] sm:$0xff]  ;;  %v295_v35 = vld [vmem:[%s4080_s7 + $0xd9] sm:$0xff] }
  0x35   : > { %3299 = vmatpush3.bf16.msra.mxu1 %v3793_v38  ;;  %3411 = vmatpush3.bf16.msra.mxu0 %v3799_v46  ;;  %v4258_v38 = vpack.c.bf16 %v222_v28, %v221_v27  ;;  %v3819_v46 = vld [vmem:[%s5116_s1 + $0x128] sm:$0xff]  }
  0x36   : > { %3300 = vmatprep.subr.bf16.mxu1 %v3794_v45  ;;  %3412 = vmatprep.subr.bf16.mxu0 %v3805_v2  ;;  %v224_v45 = vld [vmem:[%s4080_s7 + $0x80] sm:$0xff]  ;;  %v292_v2 = vld [vmem:[%s4080_s7 + $0xb1] sm:$0xff]  ;;  %v294_v18 = vld [vmem:[%s4080_s7 + $0xc9] sm:$0xff] }
  0x37   : > { %v4357_v27 = vpack.c.bf16 %v294_v18, %v293_v17  ;;  %v3831_v28 = vld [vmem:[%s5116_s1 + $0x1e8] sm:$0xff]  }
  0x38   : > { %1552 = vmatmul.mubr.bf16.gmra.mrb[4].mxu0 %v4156_v51  ;;  %1648 = vmatmul.mubr.bf16.gmra.mrb[4].mxu1 %v4158_v52  ;;  %v230_v30 = vld [vmem:[%s4080_s7 + $0xc8] sm:$0xff] }
  0x39   : > { %3301 = vmatpush3.bf16.msra.mxu1 %v3795_v53  ;;  %1559 = vmatprep.mubr.bf16.mxu0 %v4163_v54  ;;  %v3820_v53 = vld [vmem:[%s5116_s1 + $0x1d0] sm:$0xff]   ;;  %v3833_v32 = vld [vmem:[%s5116_s1 + $0x1a8] sm:$0xff]  }
  0x3a   : > { %3302 = vmatprep.subr.bf16.mxu1 %v3796_v55  ;;  %1655 = vmatprep.mubr.bf16.mxu1 %v323_v56  ;;  %v4289_v55 = vpack.c.bf16 %v224_v45, %v223_v43  ;;  %v4291_v56 = vpack.c.bf16 %v344_v48, %v343_v47  ;;  %v3836_v43 = vld [vmem:[%s5116_s1 + $0x1b0] sm:$0xff]   ;;  %v231_v45 = vld [vmem:[%s4080_s7 + $0xd8] sm:$0xff]  ;;  %v232_v47 = vld [vmem:[%s4080_s7 + $0xe0] sm:$0xff] }
  0x3b   : > { %3413 = vmatpush3.bf16.msra.mxu0 %v3807_v6  ;;  %v351_v48 = vld [vmem:[%s4080_s7 + $0x7a] sm:$0xff]  ;;  %v357_v18 = vld [vmem:[%s4080_s7 + $0xc2] sm:$0xff] }
  0x3c   : > { %3414 = vmatprep.subr.bf16.mxu0 %v3812_v19  ;;  %v3828_v19 = vld [vmem:[%s5116_s1 + $0x1e0] sm:$0xff]  }
  0x3d   : > { %3303 = vmatpush3.bf16.msra.mxu1 %v3798_v57 }
  0x3e   : > { %3304 = vmatprep.subr.bf16.mxu1 %v3800_v62  ;;  %v226_v62 = vld [vmem:[%s4080_s7 + $0x98] sm:$0xff] }
  0x3f   : > { %3415 = vmatpush3.bf16.msra.mxu0 %v3813_v22  ;;  %v4317_v6 = vpack.c.bf16 %v226_v62, %v225_v60  ;;  %v4348_v22 = vld [vmem:[%s5116_s1 + $0x200] sm:$0xff]   ;;  %v234_v62 = vld [vmem:[%s4080_s7 + $0xf8] sm:$0xff] }
  0x40   : > { %1560 = vmatmul.mubr.bf16.gmra.mrb[8].mxu0 %v4188_v4  ;;  %1656 = vmatmul.mubr.bf16.gmra.mrb[8].mxu1 %v4190_v5 }
  0x41   : > { %3305 = vmatpush3.bf16.msra.mxu1 %v3801_v7  ;;  %1567 = vmatprep.mubr.bf16.mxu0 %v4198_v8  ;;  %v4319_v7 = vpack.c.bf16 %v346_v0, %v345_v63  ;;  %v353_v63 = vld [vmem:[%s4080_s7 + $0x92] sm:$0xff]  ;;  %v354_v0 = vld [vmem:[%s4080_s7 + $0x9a] sm:$0xff] }
  0x42   : > { %3306 = vmatprep.subr.bf16.mxu1 %v3802_v9  ;;  %1663 = vmatprep.mubr.bf16.mxu1 %v324_v10  ;;  %v3825_v9 = vld [vmem:[%s5116_s1 + $0x198] sm:$0xff]   ;;  %v4324_v10 = vpack.c.bf16 %v292_v2, %v291_v1  ;;  %v299_v1 = vld [vmem:[%s4080_s7 + $0x109] sm:$0xff] }
  0x43   : > { %3416 = vmatprep.subr.bf16.mxu0 %v3814_v34  ;;  %v350_v34 = vld [vmem:[%s4080_s7 + $0x6a] sm:$0xff] }
  0x44   : > { %3417 = vmatpush3.bf16.msra.mxu0 %v3816_v36  ;;  %v296_v36 = vld [vmem:[%s4080_s7 + $0xe1] sm:$0xff]  ;;  %v300_v2 = vld [vmem:[%s4080_s7 + $0x111] sm:$0xff] }
  0x45   : > { %3307 = vmatpush3.bf16.msra.mxu1 %v3803_v11  ;;  %3418 = vmatprep.subr.bf16.mxu0 %v3818_v44  ;;  %v3826_v11 = vld [vmem:[%s5116_s1 + $0x178] sm:$0xff]   ;;  %v4386_v44 = vpack.c.bf16 %v296_v36, %v295_v35  ;;  %v3841_v36 = vld [vmem:[%s5116_s1 + $0x228] sm:$0xff]  }
  0x46   : > { %3308 = vmatprep.subr.bf16.mxu1 %v3804_v16  ;;  %v348_v16 = vld [vmem:[%s4080_s7 + $0x52] sm:$0xff] }
  0x48   : > { %1568 = vmatmul.mubr.bf16.gmra.mrb[12].mxu0 %v4221_v20  ;;  %1664 = vmatmul.mubr.bf16.gmra.mrb[12].mxu1 %v4223_v21 }
  0x49   : > { %3309 = vmatpush3.bf16.msra.mxu1 %v3806_v23  ;;  %1575 = vmatprep.mubr.bf16.mxu0 %v4231_v24  ;;  %v4350_v23 = vpack.c.bf16 %v228_v14, %v227_v13  ;;  %v236_v13 = vld [vmem:[%s4080_s7 + $0x110] sm:$0xff] }
  0x4a   : > { %3310 = vmatprep.subr.bf16.mxu1 %v3808_v25  ;;  %1704 = vmatprep.mubr.bf16.mxu1 %v4156_v51  ;;  %v290_v51 = vld [vmem:[%s4080_s7 + $0x99] sm:$0xff]  ;;  %v4352_v25 = vpack.c.bf16 %v348_v16, %v347_v15  ;;  %v355_v14 = vld [vmem:[%s4080_s7 + $0xaa] sm:$0xff] }
  0x4b   : > { %3419 = vmatpush3.bf16.msra.mxu0 %v3819_v46  ;;  %v4293_v57 = vpack.c.bf16 %v290_v51, %v289_v50  ;;  %v3837_v46 = vld [vmem:[%s5116_s1 + $0x1f8] sm:$0xff]  }
  0x4c   : > { %3420 = vmatprep.subr.bf16.mxu0 %v3822_v59  ;;  %v3839_v50 = vld [vmem:[%s5116_s1 + $0x1b8] sm:$0xff]  }
  0x4d   : > { %3311 = vmatpush3.bf16.msra.mxu1 %v3809_v26  ;;  %v3830_v26 = vld [vmem:[%s5116_s1 + $0x1a0] sm:$0xff]   ;;  %v297_v51 = vld [vmem:[%s4080_s7 + $0xf1] sm:$0xff] }
  0x4e   : > { %3520 = vmatprep.subr.bf16.mxu1 %v3810_v31  ;;  %v349_v31 = vld [vmem:[%s4080_s7 + $0x62] sm:$0xff]  ;;  %v356_v15 = vld [vmem:[%s4080_s7 + $0xb2] sm:$0xff] }
  0x4f   : > { %3421 = vmatpush3.bf16.msra.mxu0 %v3823_v61  ;;  %v233_v61 = vld [vmem:[%s4080_s7 + $0xf0] sm:$0xff]  ;;  %v4436_v17 = vpack.c.bf16 %v356_v15, %v355_v14 }
  0x50   : > { %1576 = vmatmul.mubr.bf16.gmra.mrb[16].mxu0 %v4258_v38  ;;  %1705 = vmatmul.mubr.bf16.vlgmr.msra.gmra.mrb[16].mxu1 %v373_v39  ;;  %v3834_v39 = vld [vmem:[%s5116_s1 + $0x1f0] sm:$0xff]  }
  0x51   : > { %3521 = vmatpush3.bf16.msra.mxu1 %v3811_v40  ;;  %1583 = vmatprep.mubr.bf16.mxu0 %v4263_v41  ;;  %v4379_v40 = vpack.c.bf16 %v230_v30, %v229_v29  ;;  %v359_v29 = vld [vmem:[%s4080_s7 + $0xda] sm:$0xff]  ;;  %v3835_v30 = vld [vmem:[%s5116_s1 + $0x210] sm:$0xff]  }
  0x52   : > { %1712 = vmatprep.mubr.bf16.mxu1 %v4188_v4  ;;  %3522 = vmatprep.subr.bf16.mxu1 %v3815_v42  ;;  %v4381_v42 = vpack.c.bf16 %v350_v34, %v349_v31  ;;  %v3840_v34 = vld [vmem:[%s5116_s1 + $0x220] sm:$0xff]   ;;  %v2848_v14 = vld [vmem:[%s4080_s7 + $0x18a] sm:$0xff] }
  0x53   : > { %3422 = vmatprep.subr.bf16.mxu0 %v3826_v11  ;;  %v4424_v11 = vpack.c.bf16 %v300_v2, %v299_v1  ;;  %v371_v1 = vld [vmem:[%s4080_s7 + $0x16a] sm:$0xff] }
  0x54   : > { %3423 = vmatpush3.bf16.msra.mxu0 %v3827_v12  ;;  %v235_v12 = vld [vmem:[%s4080_s7 + $0x108] sm:$0xff] }
  0x55   : > { %3523 = vmatpush3.bf16.msra.mxu1 %v3817_v49  ;;  %3656 = vmatprep.subr.bf16.mxu0 %v4348_v22  ;;  %v352_v49 = vld [vmem:[%s4080_s7 + $0x82] sm:$0xff]  ;;  %v4434_v16 = vpack.c.bf16 %v236_v13, %v235_v12 }
  0x56   : > { %3524 = vmatprep.subr.bf16.mxu1 %v3820_v53  ;;  %v298_v53 = vld [vmem:[%s4080_s7 + $0xf9] sm:$0xff]  ;;  %v4406_v59 = vpack.c.bf16 %v352_v49, %v351_v48  ;;  %v366_v48 = vld [vmem:[%s4080_s7 + $0x12a] sm:$0xff]  ;;  %v2847_v13 = vld [vmem:[%s4080_s7 + $0x182] sm:$0xff] }
  0x57   : > { %v4408_v60 = vpack.c.bf16 %v298_v53, %v297_v51  ;;  %v369_v53 = vld [vmem:[%s4080_s7 + $0x152] sm:$0xff] }
  0x58   : > { %1584 = vmatmul.mubr.bf16.gmra.mrb[20].mxu0 %v4289_v55  ;;  %1713 = vmatmul.mubr.bf16.gmra.mrb[20].mxu1 %v4291_v56 }
  0x59   : > { %1591 = vmatprep.mubr.bf16.mxu0 %v4293_v57  ;;  %1720 = vmatprep.mubr.bf16.mxu1 %v4221_v20 }
  0x5a   : > { %3525 = vmatpush3.bf16.msra.mxu1 %v3821_v58  ;;  %v4404_v58 = vpack.c.bf16 %v232_v47, %v231_v45  ;;  %v3842_v45 = vld [vmem:[%s5116_s1 + $0x230] sm:$0xff]   ;;  %v365_v47 = vld [vmem:[%s4080_s7 + $0x122] sm:$0xff] }
  0x5b   : > { %3526 = vmatprep.subr.bf16.mxu1 %v3824_v3  ;;  %v4420_v3 = vpack.c.bf16 %v234_v62, %v233_v61  ;;  %v4498_v49 = vpack.c.bf16 %v366_v48, %v365_v47  ;;  %v370_v61 = vld [vmem:[%s4080_s7 + $0x15a] sm:$0xff] }
  0x5c   : > { %v2783_v62 = vld [vmem:[%s4080_s7 + $0x180] sm:$0xff] }
  0x5e   : > { %3527 = vmatpush3.bf16.msra.mxu1 %v3825_v9  ;;  %v4422_v9 = vpack.c.bf16 %v354_v0, %v353_v63  ;;  %v4516_v63 = vpack.c.bf16 %v370_v61, %v369_v53 }
  0x5f   : > { %3528 = vmatprep.subr.bf16.mxu1 %v3828_v19  ;;  %v358_v19 = vld [vmem:[%s4080_s7 + $0xca] sm:$0xff] }
  0x60   : > { %1592 = vmatmul.mubr.bf16.gmra.mrb[24].mxu0 %v4317_v6  ;;  %1721 = vmatmul.mubr.bf16.gmra.mrb[24].mxu1 %v4319_v7 }
  0x61   : > { %1599 = vmatprep.mubr.bf16.mxu0 %v4324_v10  ;;  %1728 = vmatprep.mubr.bf16.mxu1 %v4258_v38 }
  0x62   : > { %3529 = vmatpush3.bf16.msra.mxu1 %v3830_v26  ;;  %v4444_v26 = vpack.c.bf16 %v358_v19, %v357_v18  ;;  %v2816_v18 = vld [vmem:[%s4080_s7 + $0x189] sm:$0xff] }
  0x63   : > { %3530 = vmatprep.subr.bf16.mxu1 %v3831_v28  ;;  %v3832_v28 = vld [vmem:[%s5116_s1 + $0x208] sm:$0xff]  }
  0x66   : > { %3531 = vmatpush3.bf16.msra.mxu1 %v3833_v32  ;;  %v362_v32 = vld [vmem:[%s4080_s7 + $0xfa] sm:$0xff] }
  0x67   : > { %3532 = vmatprep.subr.bf16.mxu1 %v3834_v39  ;;  %v363_v39 = vld [vmem:[%s4080_s7 + $0x10a] sm:$0xff] }
  0x68   : > { %1600 = vmatmul.mubr.bf16.gmra.mrb[28].mxu0 %v4350_v23  ;;  %1729 = vmatmul.mubr.bf16.gmra.mrb[28].mxu1 %v4352_v25 }
  0x69   : > { %1607 = vmatprep.mubr.bf16.mxu0 %v4357_v27  ;;  %1736 = vmatprep.mubr.bf16.mxu1 %v4289_v55 }
  0x6a   : > { %3533 = vmatpush3.bf16.msra.mxu1 %v3836_v43  ;;  %v364_v43 = vld [vmem:[%s4080_s7 + $0x112] sm:$0xff] }
  0x6b   : > { %3534 = vmatprep.subr.bf16.mxu1 %v3837_v46  ;;  %v4487_v46 = vpack.c.bf16 %v364_v43, %v363_v39 }
  0x6e   : > { %3535 = vmatpush3.bf16.msra.mxu1 %v3839_v50  ;;  %v368_v50 = vld [vmem:[%s4080_s7 + $0x142] sm:$0xff] }
  0x70   : > { %1608 = vmatmul.mubr.bf16.gmra.mrb[32].mxu0 %v4379_v40  ;;  %1737 = vmatmul.mubr.bf16.gmra.mrb[32].mxu1 %v4381_v42 }
  0x71   : > { %1615 = vmatprep.mubr.bf16.mxu0 %v4386_v44  ;;  %1744 = vmatprep.mubr.bf16.mxu1 %v4317_v6 }
  0x78   : > { %1616 = vmatmul.mubr.bf16.gmra.mrb[36].mxu0 %v4404_v58  ;;  %1745 = vmatmul.mubr.bf16.gmra.mrb[36].mxu1 %v4406_v59 }
  0x79   : > { %1623 = vmatprep.mubr.bf16.mxu0 %v4408_v60  ;;  %1752 = vmatprep.mubr.bf16.mxu1 %v4350_v23 }
  0x80   : > { %1624 = vmatmul.mubr.bf16.gmra.mrb[40].mxu0 %v4420_v3  ;;  %1753 = vmatmul.mubr.bf16.gmra.mrb[40].mxu1 %v4422_v9 }
  0x81   : > { %1631 = vmatprep.mubr.bf16.mxu0 %v4424_v11  ;;  %1760 = vmatprep.mubr.bf16.mxu1 %v4379_v40 }
  0x88   : > { %1632 = vmatmul.mubr.bf16.gmra.mrb[44].mxu0 %v4434_v16  ;;  %1761 = vmatmul.mubr.bf16.gmra.mrb[44].mxu1 %v4436_v17 }
  0x89   : > { %1768 = vmatprep.mubr.bf16.mxu1 %v4404_v58  ;;  %1865 = vmatprep.mubr.bf16.mxu0 %v4291_v56  ;;  %v360_v56 = vld [vmem:[%s4080_s7 + $0xe2] sm:$0xff] }
  0x8a   : > { %v4459_v31 = vpack.c.bf16 %v360_v56, %v359_v29 }
  0x90   : > { %1769 = vmatmul.mubr.bf16.gmra.mrb[48].mxu1 %v4444_v26  ;;  %1866 = vmatmul.mubr.bf16.vlgmr.msra.gmra.mrb[48].mxu0 %v4132_v37  ;;  %v3838_v37 = vld [vmem:[%s5116_s1 + $0x218] sm:$0xff]  }
  0x91   : > { %3657 = vmatpush3.bf16.msra.mxu0 %v4348_v22  ;;  %1776 = vmatprep.mubr.bf16.mxu1 %v4420_v3  ;;  %v361_v22 = vld [vmem:[%s4080_s7 + $0xf2] sm:$0xff] }
  0x92   : > { %1873 = vmatprep.mubr.bf16.mxu0 %v4319_v7  ;;  %3658 = vmatprep.subr.bf16.mxu0 %v3832_v28  ;;  %v4473_v35 = vpack.c.bf16 %v362_v32, %v361_v22 }
  0x95   : > { %3659 = vmatpush3.bf16.msra.mxu0 %v3832_v28 }
  0x96   : > { %3660 = vmatprep.subr.bf16.mxu0 %v3835_v30 }
  0x98   : > { %1777 = vmatmul.mubr.bf16.gmra.mrb[52].mxu1 %v4459_v31  ;;  %1874 = vmatmul.mubr.bf16.gmra.mrb[52].mxu0 %v4163_v54 }
  0x99   : > { %1784 = vmatprep.mubr.bf16.mxu1 %v4434_v16  ;;  %1881 = vmatprep.mubr.bf16.mxu0 %v4352_v25 }
  0x9a   : > { %3661 = vmatpush3.bf16.msra.mxu0 %v3835_v30 }
  0x9b   : > { %3662 = vmatprep.subr.bf16.mxu0 %v3838_v37 }
  0x9e   : > { %3663 = vmatpush3.bf16.msra.mxu0 %v3838_v37 }
  0x9f   : > { %3664 = vmatprep.subr.bf16.mxu0 %v3840_v34 }
  0xa0   : > { %1785 = vmatmul.mubr.bf16.gmra.mrb[56].mxu1 %v4473_v35  ;;  %1882 = vmatmul.mubr.bf16.gmra.mrb[56].mxu0 %v4198_v8 }
  0xa1   : > { %1792 = vmatprep.mubr.bf16.mxu1 %v4123_v33  ;;  %1889 = vmatprep.mubr.bf16.mxu0 %v4381_v42  ;;  %v3843_v33 = vld [vmem:[%s5116_s1 + $0x238] sm:$0xff]  }
  0xa2   : > { %3665 = vmatpush3.bf16.msra.mxu0 %v3840_v34 }
  0xa3   : > { %3666 = vmatprep.subr.bf16.mxu0 %v3841_v36 }
  0xa6   : > { %3667 = vmatpush3.bf16.msra.mxu0 %v3841_v36 }
  0xa7   : > { %3668 = vmatprep.subr.bf16.mxu0 %v3842_v45 }
  0xa8   : > { %1793 = vmatmul.mubr.bf16.gmra.mrb[60].mxu1 %v4487_v46  ;;  %1890 = vmatmul.mubr.bf16.gmra.mrb[60].mxu0 %v4231_v24 }
  0xa9   : > { %1800 = vmatprep.mubr.bf16.mxu1 %v4158_v52  ;;  %1897 = vmatprep.mubr.bf16.mxu0 %v4406_v59  ;;  %v367_v52 = vld [vmem:[%s4080_s7 + $0x13a] sm:$0xff] }
  0xaa   : > { %3669 = vmatpush3.bf16.msra.mxu0 %v3842_v45  ;;  %v4506_v51 = vpack.c.bf16 %v368_v50, %v367_v52 }
  0xab   : > { %3670 = vmatprep.subr.bf16.mxu0 %v3843_v33 }
  0xae   : > { %3671 = vmatpush3.bf16.msra.mxu0 %v3843_v33 }
  0xb0   : > { %1801 = vmatmul.mubr.bf16.gmra.mrb[64].mxu1 %v4498_v49  ;;  %1898 = vmatmul.mubr.bf16.gmra.mrb[64].mxu0 %v4263_v41 }
  0xb1   : > { %1808 = vmatprep.mubr.bf16.mxu1 %v4190_v5  ;;  %1905 = vmatprep.mubr.bf16.mxu0 %v4422_v9  ;;  %v2784_v5 = vld [vmem:[%s4080_s7 + $0x188] sm:$0xff] }
  0xb2   : > { %v4518_v0 = vpack.c.bf16 %v2784_v5, %v2783_v62 }
  0xb8   : > { %1809 = vmatmul.mubr.bf16.gmra.mrb[68].mxu1 %v4506_v51  ;;  %1906 = vmatmul.mubr.bf16.gmra.mrb[68].mxu0 %v4293_v57 }
  0xb9   : > { %1816 = vmatprep.mubr.bf16.mxu1 %v4223_v21  ;;  %1913 = vmatprep.mubr.bf16.mxu0 %v4436_v17  ;;  %v372_v21 = vld [vmem:[%s4080_s7 + $0x172] sm:$0xff] }
  0xba   : > { %v4526_v2 = vpack.c.bf16 %v372_v21, %v371_v1 }
  0xc0   : > { %1817 = vmatmul.mubr.bf16.gmra.mrb[72].mxu1 %v4516_v63  ;;  %1914 = vmatmul.mubr.bf16.gmra.mrb[72].mxu0 %v4324_v10 }
  0xc1   : > { %1824 = vmatprep.mubr.bf16.mxu1 %v4518_v0  ;;  %1921 = vmatprep.mubr.bf16.mxu0 %v4444_v26 }
  0xc8   : > { %1825 = vmatmul.mubr.bf16.gmra.mrb[76].mxu1 %v4526_v2  ;;  %1922 = vmatmul.mubr.bf16.gmra.mrb[76].mxu0 %v4357_v27 }
  0xc9   : > { %1929 = vmatprep.mubr.bf16.mxu0 %v4459_v31  ;;  %2026 = vmatprep.mubr.bf16.mxu1 %v4163_v54  ;;  %v2807_v54 = vld [vmem:[%s4080_s7 + $0x121] sm:$0xff] }
  0xd0   : > { %1930 = vmatmul.mubr.bf16.gmra.mrb[80].mxu0 %v4386_v44  ;;  %2027 = vmatmul.mubr.bf16.vlgmr.msra.gmra.mrb[80].mxu1 %v4188_v4  ;;  %v2808_v4 = vld [vmem:[%s4080_s7 + $0x129] sm:$0xff] }
  0xd1   : > { %1937 = vmatprep.mubr.bf16.mxu0 %v4473_v35  ;;  %2034 = vmatprep.mubr.bf16.mxu1 %v4198_v8  ;;  %v4546_v8 = vpack.c.bf16 %v2808_v4, %v2807_v54 }
  0xd8   : > { %1938 = vmatmul.mubr.bf16.gmra.mrb[84].mxu0 %v4408_v60  ;;  %2035 = vmatmul.mubr.bf16.gmra.mrb[84].mxu1 %v4221_v20  ;;  %v2809_v20 = vld [vmem:[%s4080_s7 + $0x139] sm:$0xff] }
  0xd9   : > { %1945 = vmatprep.mubr.bf16.mxu0 %v4487_v46  ;;  %2042 = vmatprep.mubr.bf16.mxu1 %v4231_v24  ;;  %v2810_v24 = vld [vmem:[%s4080_s7 + $0x141] sm:$0xff] }
  0xe0   : > { %1946 = vmatmul.mubr.bf16.gmra.mrb[88].mxu0 %v4424_v11  ;;  %2043 = vmatmul.mubr.bf16.gmra.mrb[88].mxu1 %v4258_v38  ;;  %v4554_v38 = vpack.c.bf16 %v2810_v24, %v2809_v20 }
  0xe1   : > { %1953 = vmatprep.mubr.bf16.mxu0 %v4498_v49  ;;  %2050 = vmatprep.mubr.bf16.mxu1 %v4263_v41  ;;  %v2811_v41 = vld [vmem:[%s4080_s7 + $0x151] sm:$0xff] }
  0xe8   : > { %1954 = vmatmul.mubr.bf16.gmra.mrb[92].mxu0 %v4546_v8  ;;  %2051 = vmatmul.mubr.bf16.gmra.mrb[92].mxu1 %v4289_v55  ;;  %v2812_v55 = vld [vmem:[%s4080_s7 + $0x159] sm:$0xff] }
  0xe9   : > { %1961 = vmatprep.mubr.bf16.mxu0 %v4506_v51  ;;  %2058 = vmatprep.mubr.bf16.mxu1 %v4293_v57  ;;  %v4562_v12 = vpack.c.bf16 %v2812_v55, %v2811_v41  ;;  %v2813_v57 = vld [vmem:[%s4080_s7 + $0x169] sm:$0xff] }
  0xf0   : > { %1962 = vmatmul.mubr.bf16.gmra.mrb[96].mxu0 %v4554_v38  ;;  %2059 = vmatmul.mubr.bf16.gmra.mrb[96].mxu1 %v4317_v6  ;;  %v2814_v6 = vld [vmem:[%s4080_s7 + $0x171] sm:$0xff] }
  0xf1   : > { %1969 = vmatprep.mubr.bf16.mxu0 %v4516_v63  ;;  %2066 = vmatprep.mubr.bf16.mxu1 %v4324_v10  ;;  %v4572_v15 = vpack.c.bf16 %v2814_v6, %v2813_v57  ;;  %v4574_v10 = vpack.c.bf16 %v2848_v14, %v2847_v13 }
  0xf8   : > { %1970 = vmatmul.mubr.bf16.gmra.mrb[100].mxu0 %v4562_v12  ;;  %2067 = vmatmul.mubr.bf16.gmra.mrb[100].mxu1 %v4350_v23  ;;  %v2815_v23 = vld [vmem:[%s4080_s7 + $0x181] sm:$0xff] }
  0xf9   : > { %1977 = vmatprep.mubr.bf16.mxu0 %v4526_v2  ;;  %2074 = vmatprep.mubr.bf16.mxu1 %v4357_v27  ;;  %v4582_v56 = vpack.c.bf16 %v2816_v18, %v2815_v23 }
 0x100   : > { %1978 = vmatmul.mubr.bf16.gmra.mrb[104].mxu0 %v4572_v15  ;;  %2075 = vmatmul.mubr.bf16.gmra.mrb[104].mxu1 %v4379_v40 }
 0x101   : > { %1985 = vmatprep.mubr.bf16.mxu0 %v4574_v10  ;;  %2082 = vmatprep.mubr.bf16.mxu1 %v4386_v44 }
 0x103   : > { %v3200_v19 = vpop.f32.mrb[0].mxu0  ;;  %v3272_v27 = vpop.f32.mrb[0].mxu1 }
 0x104   : > { %v3201_v28 = vpop.f32.mrb[1].mxu0  ;;  %v3273_v29 = vpop.f32.mrb[1].mxu1 }
 0x105   : > { %v4584_v30 = vadd.f32 %v3201_v28, %v3200_v19  ;;  %v4586_v37 = vadd.f32 %v3273_v29, %v3272_v27  ;;  %v3203_v22 = vpop.f32.mrb[2].mxu0  ;;  %v3275_v32 = vpop.f32.mrb[2].mxu1  ;;  %v2871_v28 = vld [vmem:[%s4080_s7 + $0x138] sm:$0xff]  ;;  %v2872_v29 = vld [vmem:[%s4080_s7 + $0x140] sm:$0xff] }
 0x106   : > { %v3204_v34 = vpop.f32.mrb[3].mxu0  ;;  %v3276_v40 = vpop.f32.mrb[3].mxu1 }
 0x107   : > { %v4588_v36 = vadd.f32 %v3204_v34, %v3203_v22  ;;  %v4590_v39 = vadd.f32 %v3276_v40, %v3275_v32 }
 0x108   : > { %1986 = vmatmul.mubr.bf16.gmra.mrb[108].mxu0 %v4582_v56  ;;  %2083 = vmatmul.mubr.bf16.gmra.mrb[108].mxu1 %v4404_v58 }
 0x109   : > { %2090 = vmatprep.mubr.bf16.mxu1 %v4408_v60  ;;  %3672 = vmatprep.mubr.bf16.mxu0 %v4319_v7 }
 0x10b   : > { %v3206_v44 = vpop.f32.mrb[4].mxu0  ;;  %v3278_v43 = vpop.f32.mrb[4].mxu1 }
 0x10c   : > { %v3207_v45 = vpop.f32.mrb[5].mxu0  ;;  %v3279_v33 = vpop.f32.mrb[5].mxu1 }
 0x10d   : > { %v4596_v47 = vadd.f32 %v3207_v45, %v3206_v44  ;;  %v4598_v48 = vadd.f32 %v3279_v33, %v3278_v43  ;;  %v3209_v52 = vpop.f32.mrb[6].mxu0  ;;  %v3281_v50 = vpop.f32.mrb[6].mxu1  ;;  %v642_v44 = vpack.c.bf16 %v2872_v29, %v2871_v28 }
 0x10e   : > { %v3210_v53 = vpop.f32.mrb[7].mxu0  ;;  %v3282_v61 = vpop.f32.mrb[7].mxu1 }
 0x10f   : > { %v4600_v62 = vadd.f32 %v3210_v53, %v3209_v52  ;;  %v4602_v5 = vadd.f32 %v3282_v61, %v3281_v50 }
 0x110   : > { %2091 = vmatmul.mubr.bf16.gmra.mrb[112].mxu1 %v4420_v3  ;;  %3673 = vmatmul.mubr.bf16.vlgmr.msra.gmra.mrb[112].mxu0 %v4352_v25 }
 0x111   : > { %2098 = vmatprep.mubr.bf16.mxu1 %v4424_v11  ;;  %3676 = vmatprep.mubr.bf16.mxu0 %v4381_v42  ;;  %v2869_v42 = vld [vmem:[%s4080_s7 + $0x120] sm:$0xff]  ;;  %v2870_v11 = vld [vmem:[%s4080_s7 + $0x128] sm:$0xff] }
 0x112   : > { %v641_v14 = vpack.c.bf16 %v2870_v11, %v2869_v42 }
 0x113   : > { %v3212_v7 = vpop.f32.mrb[8].mxu0  ;;  %v3284_v58 = vpop.f32.mrb[8].mxu1 }
 0x114   : > { %v3213_v60 = vpop.f32.mrb[9].mxu0  ;;  %v3285_v1 = vpop.f32.mrb[9].mxu1 }
 0x115   : > { %v4608_v21 = vadd.f32 %v3213_v60, %v3212_v7  ;;  %v4610_v54 = vadd.f32 %v3285_v1, %v3284_v58  ;;  %v3215_v4 = vpop.f32.mrb[10].mxu0  ;;  %v3287_v20 = vpop.f32.mrb[10].mxu1  ;;  %v2873_v7 = vld [vmem:[%s4080_s7 + $0x150] sm:$0xff]  ;;  %v2874_v58 = vld [vmem:[%s4080_s7 + $0x158] sm:$0xff] }
 0x116   : > { %v3216_v24 = vpop.f32.mrb[11].mxu0  ;;  %v3288_v3 = vpop.f32.mrb[11].mxu1 }
 0x117   : > { %v4612_v41 = vadd.f32 %v3216_v24, %v3215_v4  ;;  %v4614_v25 = vadd.f32 %v3288_v3, %v3287_v20  ;;  %v643_v20 = vpack.c.bf16 %v2874_v58, %v2873_v7 }
 0x118   : > { %2099 = vmatmul.mubr.bf16.gmra.mrb[116].mxu1 %v4434_v16  ;;  %3677 = vmatmul.mubr.bf16.gmra.mrb[116].mxu0 %v4406_v59 }
 0x119   : > { %2106 = vmatprep.mubr.bf16.mxu1 %v4546_v8  ;;  %3680 = vmatprep.mubr.bf16.mxu0 %v4422_v9 }
 0x11b   : > { %v3218_v55 = vpop.f32.mrb[12].mxu0  ;;  %v3290_v57 = vpop.f32.mrb[12].mxu1 }
 0x11c   : > { %v3219_v6 = vpop.f32.mrb[13].mxu0  ;;  %v3291_v13 = vpop.f32.mrb[13].mxu1 }
 0x11d   : > { %v4622_v23 = vadd.f32 %v3219_v6, %v3218_v55  ;;  %v4624_v18 = vadd.f32 %v3291_v13, %v3290_v57  ;;  %v3221_v16 = vpop.f32.mrb[14].mxu0  ;;  %v3293_v19 = vpop.f32.mrb[14].mxu1  ;;  %v2875_v6 = vld [vmem:[%s4080_s7 + $0x168] sm:$0xff]  ;;  %v2876_v13 = vld [vmem:[%s4080_s7 + $0x170] sm:$0xff] }
 0x11e   : > { %v3222_v59 = vpop.f32.mrb[15].mxu0  ;;  %v3294_v27 = vpop.f32.mrb[15].mxu1 }
 0x11f   : > { %v4626_v8 = vadd.f32 %v3222_v59, %v3221_v16  ;;  %v4628_v9 = vadd.f32 %v3294_v27, %v3293_v19  ;;  %v644_v59 = vpack.c.bf16 %v2876_v13, %v2875_v6 }
 0x120   : > { %2107 = vmatmul.mubr.bf16.gmra.mrb[120].mxu1 %v641_v14  ;;  %3681 = vmatmul.mubr.bf16.gmra.mrb[120].mxu0 %v4436_v17 }
 0x121   : > { %2114 = vmatprep.mubr.bf16.mxu1 %v4554_v38  ;;  %3684 = vmatprep.mubr.bf16.mxu0 %v4444_v26 }
 0x123   : > { %v3224_v22 = vpop.f32.mrb[16].mxu0  ;;  %v3312_v32 = vpop.f32.mrb[16].mxu1 }
 0x124   : > { %v3225_v34 = vpop.f32.mrb[17].mxu0  ;;  %v3313_v40 = vpop.f32.mrb[17].mxu1 }
 0x125   : > { %v4635_v43 = vadd.f32 %v3225_v34, %v3224_v22  ;;  %v3314_v45 = vadd.f32 %v3313_v40, %v3312_v32  ;;  %v3227_v33 = vpop.f32.mrb[18].mxu0  ;;  %v3315_v52 = vpop.f32.mrb[18].mxu1  ;;  %v2911_v40 = vld [vmem:[%s4080_s7 + $0x199] sm:$0xff] }
 0x126   : > { %v3228_v50 = vpop.f32.mrb[19].mxu0  ;;  %v3316_v17 = vpop.f32.mrb[19].mxu1 }
 0x127   : > { %v4638_v38 = vadd.f32 %v3314_v45, %v4584_v30  ;;  %v4640_v26 = vadd.f32 %v3228_v50, %v3227_v33  ;;  %v3317_v53 = vadd.f32 %v3316_v17, %v3315_v52 }
 0x128   : > { %2115 = vmatmul.mubr.bf16.gmra.mrb[124].mxu1 %v642_v44  ;;  %3685 = vmatmul.mubr.bf16.gmra.mrb[124].mxu0 %v4459_v31  ;;  %v2912_v44 = vld [vmem:[%s4080_s7 + $0x1a1] sm:$0xff] }
 0x129   : > { %v4644_v61 = vadd.f32 %v3317_v53, %v4588_v36  ;;  %2122 = vmatprep.mubr.bf16.mxu1 %v4562_v12  ;;  %3688 = vmatprep.mubr.bf16.mxu0 %v4473_v35  ;;  %v710_v53 = vpack.c.bf16 %v2912_v44, %v2911_v40 }
 0x12b   : > { %v3230_v60 = vpop.f32.mrb[20].mxu0  ;;  %v3318_v1 = vpop.f32.mrb[20].mxu1 }
 0x12c   : > { %v3231_v4 = vpop.f32.mrb[21].mxu0  ;;  %v3319_v30 = vpop.f32.mrb[21].mxu1 }
 0x12d   : > { %v4650_v24 = vadd.f32 %v3231_v4, %v3230_v60  ;;  %v3320_v3 = vadd.f32 %v3319_v30, %v3318_v1  ;;  %v3233_v31 = vpop.f32.mrb[22].mxu0  ;;  %v3321_v42 = vpop.f32.mrb[22].mxu1  ;;  %v2879_v1 = vld [vmem:[%s4080_s7 + $0x198] sm:$0xff]  ;;  %v2880_v30 = vld [vmem:[%s4080_s7 + $0x1a0] sm:$0xff] }
 0x12e   : > { %v3234_v36 = vpop.f32.mrb[23].mxu0  ;;  %v3322_v11 = vpop.f32.mrb[23].mxu1 }
 0x12f   : > { %v4653_v12 = vadd.f32 %v3320_v3, %v4596_v47  ;;  %v4655_v35 = vadd.f32 %v3234_v36, %v3233_v31  ;;  %v3323_v55 = vadd.f32 %v3322_v11, %v3321_v42  ;;  %v2944_v3 = vld [vmem:[%s4080_s7 + $0x1a2] sm:$0xff]  ;;  %v646_v11 = vpack.c.bf16 %v2880_v30, %v2879_v1 }
 0x130   : > { %2123 = vmatmul.mubr.bf16.gmra.mrb[128].mxu1 %v643_v20  ;;  %3689 = vmatmul.mubr.bf16.gmra.mrb[128].mxu0 %v4487_v46  ;;  %v2943_v20 = vld [vmem:[%s4080_s7 + $0x19a] sm:$0xff]  ;;  %s4921_s7 = sand.u32 1, %s3958_s16  }
 0x131   : > { %v4659_v57 = vadd.f32 %v3323_v55, %v4600_v62  ;;  %2130 = vmatprep.mubr.bf16.mxu1 %v4572_v15  ;;  %3692 = vmatprep.mubr.bf16.mxu0 %v4498_v49  ;;  %v774_v55 = vpack.c.bf16 %v2944_v3, %v2943_v20  ;;  %s2751_s14 = sshll.u32 %s4921_s7, 7  ;;  %s2585_s5 = scalar_lea.sflag [#allocation4], %s4921_s7 }
 0x132   : > { %s4937_s22 = scalar_lea.vmem [#allocation3], %s2751_s14 }
 0x133   : > { %v3236_v14 = vpop.f32.mrb[24].mxu0  ;;  %v3324_v16 = vpop.f32.mrb[24].mxu1  ;;  %s2606_s27 = sshll.u32 %s4937_s22, 4  ;;  %s5001_s27 = int_to_ptr.vmem [resolvable:$true] %s2606_s27 }
 0x134   : > { %v3237_v19 = vpop.f32.mrb[25].mxu0  ;;  %v3325_v47 = vpop.f32.mrb[25].mxu1  ;;  %s3844_s6 = scalar_lea.vmem %s5001_s27, 2048  ;;  %p3851_p0 = scmp.lt.s32.totalorder %s5001_s27, %s3849_s9 }
 0x135   : > { %v4665_v27 = vadd.f32 %v3237_v19, %v3236_v14  ;;  %v3326_v28 = vadd.f32 %v3325_v47, %v3324_v16  ;;  %v3239_v46 = vpop.f32.mrb[26].mxu0  ;;  %v3327_v29 = vpop.f32.mrb[26].mxu1  ;;  %p3845_p11 = scmp.ne.s32.totalorder %s5001_s27, %s3844_s6  ;;  %p3852_p1 = scmp.lt.s32.totalorder %s3850_s10, %s3844_s6 }
 0x136   : > { %v3240_v62 = vpop.f32.mrb[27].mxu0  ;;  %v3328_v22 = vpop.f32.mrb[27].mxu1 }
 0x137   : > { %v4668_v15 = vadd.f32 %v3326_v28, %v4608_v21  ;;  %v4670_v49 = vadd.f32 %v3240_v62, %v3239_v46  ;;  %v3329_v32 = vadd.f32 %v3328_v22, %v3327_v29  ;;  %p3846_p12 = pnand %p3845_p11, %p4038_p5  ;;  %p3853_p2 = por %p3852_p1, %p3851_p0 }
 0x138   : > { %2131 = vmatmul.mubr.bf16.gmra.mrb[132].mxu1 %v644_v59  ;;  %3693 = vmatmul.mubr.bf16.gmra.mrb[132].mxu0 %v4506_v51 }
 0x139   : > { %v4674_v34 = vadd.f32 %v3329_v32, %v4612_v41  ;;  %2138 = vmatprep.mubr.bf16.mxu1 %v4582_v56  ;;  %3696 = vmatprep.mubr.bf16.mxu0 %v4516_v63  ;;  %p3847_p13 = pneg %p3846_p12 }
 0x13b   : > { %v3242_v45 = vpop.f32.mrb[28].mxu0  ;;  %v3330_v33 = vpop.f32.mrb[28].mxu1  ;;  %p3854_p3 = pnand %p3853_p2, %p3847_p13 }
 0x13c   : > { %v3243_v21 = vpop.f32.mrb[29].mxu0  ;;  %v3331_v52 = vpop.f32.mrb[29].mxu1 }
 0x13d   : > { %v4680_v50 = vadd.f32 %v3243_v21, %v3242_v45  ;;  %v3332_v17 = vadd.f32 %v3331_v52, %v3330_v33  ;;  %v3245_v51 = vpop.f32.mrb[30].mxu0  ;;  %v3333_v41 = vpop.f32.mrb[30].mxu1 }
 0x13e   : > { %v3246_v7 = vpop.f32.mrb[31].mxu0  ;;  %v3334_v56 = vpop.f32.mrb[31].mxu1 }
 0x13f   : > { %v4683_v63 = vadd.f32 %v3332_v17, %v4622_v23  ;;  %v4685_v58 = vadd.f32 %v3246_v7, %v3245_v51  ;;  %v3335_v60 = vadd.f32 %v3334_v56, %v3333_v41 }
 0x140   : > { %2139 = vmatmul.mubr.bf16.gmra.mrb[136].mxu1 %v4518_v0  ;;  %3697 = vmatmul.mubr.bf16.gmra.mrb[136].mxu0 %v4526_v2 }
 0x141   : > { %v4691_v4 = vadd.f32 %v3335_v60, %v4626_v8  ;;  %2146 = vmatprep.mubr.bf16.mxu1 %v710_v53  ;;  %3700 = vmatprep.mubr.bf16.mxu0 %v4574_v10 }
 0x143   : > { %v3248_v31 = vpop.f32.mrb[32].mxu0  ;;  %v3336_v23 = vpop.f32.mrb[32].mxu1 }
 0x144   : > { %v3249_v42 = vpop.f32.mrb[33].mxu0  ;;  %v3337_v36 = vpop.f32.mrb[33].mxu1 }
 0x145   : > { %v4697_v6 = vadd.f32 %v3249_v42, %v3248_v31  ;;  %v3338_v0 = vadd.f32 %v3337_v36, %v3336_v23  ;;  %v3251_v2 = vpop.f32.mrb[34].mxu0  ;;  %v3339_v13 = vpop.f32.mrb[34].mxu1 }
 0x146   : > { %v3252_v14 = vpop.f32.mrb[35].mxu0  ;;  %v3340_v8 = vpop.f32.mrb[35].mxu1 }
 0x147   : > { %v4700_v16 = vadd.f32 %v3338_v0, %v4635_v43  ;;  %v3253_v10 = vadd.f32 %v3252_v14, %v3251_v2  ;;  %v3341_v19 = vadd.f32 %v3340_v8, %v3339_v13 }
 0x148   : > { %2147 = vmatmul.mubr.bf16.gmra.mrb[140].mxu1 %v646_v11  ;;  %3701 = vmatmul.mubr.bf16.gmra.mrb[140].mxu0 %v774_v55 }
 0x149   : > { %v4703_v47 = vadd.f32 %v3341_v19, %v4640_v26 }
 0x14b   : > { %v3254_v59 = vpop.f32.mrb[36].mxu0  ;;  %v3342_v28 = vpop.f32.mrb[36].mxu1 }
 0x14c   : > { %v3255_v46 = vpop.f32.mrb[37].mxu0  ;;  %v3343_v29 = vpop.f32.mrb[37].mxu1 }
 0x14d   : > { %v4705_v62 = vadd.f32 %v3255_v46, %v3254_v59  ;;  %v3344_v22 = vadd.f32 %v3343_v29, %v3342_v28  ;;  %v3257_v32 = vpop.f32.mrb[38].mxu0  ;;  %v3345_v40 = vpop.f32.mrb[38].mxu1 }
 0x14e   : > { %v3258_v44 = vpop.f32.mrb[39].mxu0  ;;  %v3346_v45 = vpop.f32.mrb[39].mxu1 }
 0x14f   : > { %v4708_v43 = vadd.f32 %v3344_v22, %v4650_v24  ;;  %v3259_v33 = vadd.f32 %v3258_v44, %v3257_v32  ;;  %v3347_v21 = vadd.f32 %v3346_v45, %v3345_v40 }
 0x151   : > { %v4711_v52 = vadd.f32 %v3347_v21, %v4655_v35 }
 0x153   : > { %v3260_v26 = vpop.f32.mrb[40].mxu0  ;;  %v3348_v17 = vpop.f32.mrb[40].mxu1 }
 0x154   : > { %v3261_v51 = vpop.f32.mrb[41].mxu0  ;;  %v3349_v41 = vpop.f32.mrb[41].mxu1 }
 0x155   : > { %v4713_v53 = vadd.f32 %v3261_v51, %v3260_v26  ;;  %v3350_v7 = vadd.f32 %v3349_v41, %v3348_v17  ;;  %v3263_v56 = vpop.f32.mrb[42].mxu0  ;;  %v3351_v60 = vpop.f32.mrb[42].mxu1 }
 0x156   : > { %v3264_v1 = vpop.f32.mrb[43].mxu0  ;;  %v3352_v30 = vpop.f32.mrb[43].mxu1 }
 0x157   : > { %v4716_v20 = vadd.f32 %v3350_v7, %v4665_v27  ;;  %v4718_v24 = vadd.f32 %v3264_v1, %v3263_v56  ;;  %v3353_v3 = vadd.f32 %v3352_v30, %v3351_v60 }
 0x159   : > { %v4721_v35 = vadd.f32 %v3353_v3, %v4670_v49 }
 0x15b   : > { %v3266_v31 = vpop.f32.mrb[44].mxu0  ;;  %v3354_v23 = vpop.f32.mrb[44].mxu1 }
 0x15c   : > { %v3267_v42 = vpop.f32.mrb[45].mxu0  ;;  %v3355_v36 = vpop.f32.mrb[45].mxu1 }
 0x15d   : > { %v4723_v11 = vadd.f32 %v3267_v42, %v3266_v31  ;;  %v3356_v55 = vadd.f32 %v3355_v36, %v3354_v23  ;;  %v3269_v0 = vpop.f32.mrb[46].mxu0  ;;  %v3357_v2 = vpop.f32.mrb[46].mxu1 }
 0x15e   : > { %v3270_v13 = vpop.f32.mrb[47].mxu0  ;;  %v3358_v14 = vpop.f32.mrb[47].mxu1 }
 0x15f   : > { %v4726_v27 = vadd.f32 %v3356_v55, %v4680_v50  ;;  %v4728_v8 = vadd.f32 %v3270_v13, %v3269_v0  ;;  %v3359_v19 = vadd.f32 %v3358_v14, %v3357_v2 }
 0x161   : > { %v4731_v49 = vadd.f32 %v3359_v19, %v4685_v58 }
 0x163   : > { %v3360_v59 = vpop.f32.mrb[48].mxu1  ;;  %v3424_v28 = vpop.f32.mrb[48].mxu0 }
 0x164   : > { %v3361_v46 = vpop.f32.mrb[49].mxu1  ;;  %v3425_v29 = vpop.f32.mrb[49].mxu0 }
 0x165   : > { %v3362_v22 = vadd.f32 %v3361_v46, %v3360_v59  ;;  %v3426_v32 = vadd.f32 %v3425_v29, %v3424_v28  ;;  %v3363_v40 = vpop.f32.mrb[50].mxu1  ;;  %v3427_v44 = vpop.f32.mrb[50].mxu0 }
 0x166   : > { %v3364_v45 = vpop.f32.mrb[51].mxu1  ;;  %v3428_v21 = vpop.f32.mrb[51].mxu0 }
 0x167   : > { %v4734_v26 = vadd.f32 %v3362_v22, %v4697_v6  ;;  %v4737_v50 = vadd.f32 %v3426_v32, %v4638_v38  ;;  %v3365_v17 = vadd.f32 %v3364_v45, %v3363_v40  ;;  %v3429_v51 = vadd.f32 %v3428_v21, %v3427_v44 }
 0x169   : > { %v4739_v58 = vadd.f32 %v3365_v17, %v3253_v10  ;;  %v4742_v41 = vadd.f32 %v3429_v51, %v4644_v61 }
 0x16b   : > { %v3366_v7 = vpop.f32.mrb[52].mxu1  ;;  %v3430_v56 = vpop.f32.mrb[52].mxu0 }
 0x16c   : > { %v3367_v60 = vpop.f32.mrb[53].mxu1  ;;  %v3431_v1 = vpop.f32.mrb[53].mxu0 }
 0x16d   : > { %v3368_v30 = vadd.f32 %v3367_v60, %v3366_v7  ;;  %v3432_v3 = vadd.f32 %v3431_v1, %v3430_v56  ;;  %v3369_v31 = vpop.f32.mrb[54].mxu1  ;;  %v3433_v23 = vpop.f32.mrb[54].mxu0 }
 0x16e   : > { %v3370_v6 = vpop.f32.mrb[55].mxu1  ;;  %v3434_v42 = vpop.f32.mrb[55].mxu0 }
 0x16f   : > { %v4745_v38 = vadd.f32 %v3368_v30, %v4705_v62  ;;  %v4748_v36 = vadd.f32 %v3432_v3, %v4653_v12  ;;  %v3371_v10 = vadd.f32 %v3370_v6, %v3369_v31  ;;  %v3435_v55 = vadd.f32 %v3434_v42, %v3433_v23 }
 0x171   : > { %v4750_v61 = vadd.f32 %v3371_v10, %v3259_v33  ;;  %v4753_v0 = vadd.f32 %v3435_v55, %v4659_v57 }
 0x173   : > { %v3372_v2 = vpop.f32.mrb[56].mxu1  ;;  %v3436_v13 = vpop.f32.mrb[56].mxu0 }
 0x174   : > { %v3373_v14 = vpop.f32.mrb[57].mxu1  ;;  %v3437_v19 = vpop.f32.mrb[57].mxu0 }
 0x175   : > { %v3374_v59 = vadd.f32 %v3373_v14, %v3372_v2  ;;  %v3438_v28 = vadd.f32 %v3437_v19, %v3436_v13  ;;  %v3375_v46 = vpop.f32.mrb[58].mxu1  ;;  %v3439_v29 = vpop.f32.mrb[58].mxu0 }
 0x176   : > { %v3376_v62 = vpop.f32.mrb[59].mxu1  ;;  %v3440_v22 = vpop.f32.mrb[59].mxu0 }
 0x177   : > { %v4756_v12 = vadd.f32 %v3374_v59, %v4713_v53  ;;  %v4759_v32 = vadd.f32 %v3438_v28, %v4668_v15  ;;  %v3377_v33 = vadd.f32 %v3376_v62, %v3375_v46  ;;  %v3441_v40 = vadd.f32 %v3440_v22, %v3439_v29 }
 0x179   : > { %v4762_v57 = vadd.f32 %v3377_v33, %v4718_v24  ;;  %v4765_v44 = vadd.f32 %v3441_v40, %v4674_v34 }
 0x17b   : > { %v3378_v45 = vpop.f32.mrb[60].mxu1  ;;  %v3442_v21 = vpop.f32.mrb[60].mxu0 }
 0x17c   : > { %v3379_v17 = vpop.f32.mrb[61].mxu1  ;;  %v3443_v51 = vpop.f32.mrb[61].mxu0 }
 0x17d   : > { %v3380_v7 = vadd.f32 %v3379_v17, %v3378_v45  ;;  %v3444_v56 = vadd.f32 %v3443_v51, %v3442_v21  ;;  %v3381_v60 = vpop.f32.mrb[62].mxu1  ;;  %v3445_v53 = vpop.f32.mrb[62].mxu0 }
 0x17e   : > { %v3382_v1 = vpop.f32.mrb[63].mxu1  ;;  %v3446_v30 = vpop.f32.mrb[63].mxu0 }
 0x17f   : > { %v4768_v15 = vadd.f32 %v3380_v7, %v4723_v11  ;;  %v4771_v3 = vadd.f32 %v3444_v56, %v4683_v63  ;;  %v3383_v24 = vadd.f32 %v3382_v1, %v3381_v60  ;;  %v3447_v31 = vadd.f32 %v3446_v30, %v3445_v53 }
 0x181   : > { %v4774_v34 = vadd.f32 %v3383_v24, %v4728_v8  ;;  %v4777_v23 = vadd.f32 %v3447_v31, %v4691_v4 }
 0x183   : > { %v3384_v6 = vpop.f32.mrb[64].mxu1  ;;  %v3448_v42 = vpop.f32.mrb[64].mxu0 }
 0x184   : > { %v3385_v10 = vpop.f32.mrb[65].mxu1  ;;  %v3449_v55 = vpop.f32.mrb[65].mxu0 }
 0x185   : > { %v3386_v2 = vadd.f32 %v3385_v10, %v3384_v6  ;;  %v3450_v13 = vadd.f32 %v3449_v55, %v3448_v42  ;;  %v3387_v14 = vpop.f32.mrb[66].mxu1  ;;  %v3451_v11 = vpop.f32.mrb[66].mxu0 }
 0x186   : > { %v3388_v19 = vpop.f32.mrb[67].mxu1  ;;  %v3452_v59 = vpop.f32.mrb[67].mxu0 }
 0x187   : > { %v4780_v63 = vadd.f32 %v3386_v2, %v4586_v37  ;;  %v4783_v28 = vadd.f32 %v3450_v13, %v4700_v16  ;;  %v3389_v8 = vadd.f32 %v3388_v19, %v3387_v14  ;;  %v3453_v46 = vadd.f32 %v3452_v59, %v3451_v11 }
 0x189   : > { %v4786_v4 = vadd.f32 %v3389_v8, %v4590_v39  ;;  %v4789_v29 = vadd.f32 %v3453_v46, %v4703_v47 }
 0x18b   : > { %v3390_v62 = vpop.f32.mrb[68].mxu1  ;;  %v3454_v22 = vpop.f32.mrb[68].mxu0 }
 0x18c   : > { %v3391_v33 = vpop.f32.mrb[69].mxu1  ;;  %v3455_v40 = vpop.f32.mrb[69].mxu0 }
 0x18d   : > { %v3392_v45 = vadd.f32 %v3391_v33, %v3390_v62  ;;  %v3456_v21 = vadd.f32 %v3455_v40, %v3454_v22  ;;  %v3393_v17 = vpop.f32.mrb[70].mxu1  ;;  %v3457_v37 = vpop.f32.mrb[70].mxu0 }
 0x18e   : > { %v3394_v51 = vpop.f32.mrb[71].mxu1  ;;  %v3458_v7 = vpop.f32.mrb[71].mxu0 }
 0x18f   : > { %v4792_v16 = vadd.f32 %v3392_v45, %v4598_v48  ;;  %v4795_v56 = vadd.f32 %v3456_v21, %v4708_v43  ;;  %v3395_v39 = vadd.f32 %v3394_v51, %v3393_v17  ;;  %v3459_v60 = vadd.f32 %v3458_v7, %v3457_v37 }
 0x191   : > { %v4798_v47 = vadd.f32 %v3395_v39, %v4602_v5  ;;  %v4801_v53 = vadd.f32 %v3459_v60, %v4711_v52 }
 0x193   : > { %v3396_v1 = vpop.f32.mrb[72].mxu1  ;;  %v3460_v30 = vpop.f32.mrb[72].mxu0 }
 0x194   : > { %v3397_v24 = vpop.f32.mrb[73].mxu1  ;;  %v3461_v31 = vpop.f32.mrb[73].mxu0 }
 0x195   : > { %v3398_v6 = vadd.f32 %v3397_v24, %v3396_v1  ;;  %v3462_v42 = vadd.f32 %v3461_v31, %v3460_v30  ;;  %v3399_v10 = vpop.f32.mrb[74].mxu1  ;;  %v3463_v48 = vpop.f32.mrb[74].mxu0 }
 0x196   : > { %v3400_v55 = vpop.f32.mrb[75].mxu1  ;;  %v3464_v2 = vpop.f32.mrb[75].mxu0 }
 0x197   : > { %v4804_v43 = vadd.f32 %v3398_v6, %v4610_v54  ;;  %v4807_v13 = vadd.f32 %v3462_v42, %v4716_v20  ;;  %v3401_v5 = vadd.f32 %v3400_v55, %v3399_v10  ;;  %v3465_v14 = vadd.f32 %v3464_v2, %v3463_v48 }
 0x199   : > { %v4810_v52 = vadd.f32 %v3401_v5, %v4614_v25  ;;  %v4813_v11 = vadd.f32 %v3465_v14, %v4721_v35 }
 0x19b   : > { %v3402_v19 = vpop.f32.mrb[76].mxu1  ;;  %v3466_v59 = vpop.f32.mrb[76].mxu0 }
 0x19c   : > { %v3403_v8 = vpop.f32.mrb[77].mxu1  ;;  %v3467_v46 = vpop.f32.mrb[77].mxu0 }
 0x19d   : > { %v3404_v62 = vadd.f32 %v3403_v8, %v3402_v19  ;;  %v3468_v22 = vadd.f32 %v3467_v46, %v3466_v59  ;;  %v3405_v33 = vpop.f32.mrb[78].mxu1  ;;  %v3469_v54 = vpop.f32.mrb[78].mxu0 }
 0x19e   : > { %v3406_v40 = vpop.f32.mrb[79].mxu1  ;;  %v3470_v45 = vpop.f32.mrb[79].mxu0 }
 0x19f   : > { %v4816_v20 = vadd.f32 %v3404_v62, %v4624_v18  ;;  %v4819_v21 = vadd.f32 %v3468_v22, %v4726_v27  ;;  %v3407_v25 = vadd.f32 %v3406_v40, %v3405_v33  ;;  %v3471_v17 = vadd.f32 %v3470_v45, %v3469_v54 }
 0x1a1   : > { %v4822_v35 = vadd.f32 %v3407_v25, %v4628_v9  ;;  %v4825_v37 = vadd.f32 %v3471_v17, %v4731_v49 }
 0x1a3   : > { %v3472_v51 = vpop.f32.mrb[80].mxu0  ;;  %v3536_v7 = vpop.f32.mrb[80].mxu1 }
 0x1a4   : > { %v3473_v39 = vpop.f32.mrb[81].mxu0  ;;  %v3537_v60 = vpop.f32.mrb[81].mxu1 }
 0x1a5   : > { %v3474_v1 = vadd.f32 %v3473_v39, %v3472_v51  ;;  %v3538_v30 = vadd.f32 %v3537_v60, %v3536_v7  ;;  %v3475_v24 = vpop.f32.mrb[82].mxu0  ;;  %v3539_v18 = vpop.f32.mrb[82].mxu1 }
 0x1a6   : > { %v3476_v31 = vpop.f32.mrb[83].mxu0  ;;  %v3540_v6 = vpop.f32.mrb[83].mxu1 }
 0x1a7   : > { %v4828_v27 = vadd.f32 %v3474_v1, %v4734_v26  ;;  %v3477_v42 = vadd.f32 %v3476_v31, %v3475_v24  ;;  %v3541_v10 = vadd.f32 %v3540_v6, %v3539_v18  ;;  %v4831_v9 = vadd.f32 %v3538_v30, %v4737_v50 }
 0x1a9   : > { %v4834_v49 = vadd.f32 %v3477_v42, %v4739_v58  ;;  %v4837_v48 = vadd.f32 %v3541_v10, %v4742_v41 }
 0x1ab   : > { %v3478_v55 = vpop.f32.mrb[84].mxu0  ;;  %v3542_v2 = vpop.f32.mrb[84].mxu1 }
 0x1ac   : > { %v3479_v5 = vpop.f32.mrb[85].mxu0  ;;  %v3543_v14 = vpop.f32.mrb[85].mxu1 }
 0x1ad   : > { %v3480_v19 = vadd.f32 %v3479_v5, %v3478_v55  ;;  %v3544_v59 = vadd.f32 %v3543_v14, %v3542_v2  ;;  %v3481_v8 = vpop.f32.mrb[86].mxu0  ;;  %v3545_v26 = vpop.f32.mrb[86].mxu1 }
 0x1ae   : > { %v3482_v46 = vpop.f32.mrb[87].mxu0  ;;  %v3546_v62 = vpop.f32.mrb[87].mxu1 }
 0x1af   : > { %v4840_v22 = vadd.f32 %v3480_v19, %v4745_v38  ;;  %v3483_v50 = vadd.f32 %v3482_v46, %v3481_v8  ;;  %v3547_v33 = vadd.f32 %v3546_v62, %v3545_v26  ;;  %v4843_v58 = vadd.f32 %v3544_v59, %v4748_v36 }
 0x1b1   : > { %v4846_v41 = vadd.f32 %v3483_v50, %v4750_v61  ;;  %v4849_v54 = vadd.f32 %v3547_v33, %v4753_v0 }
 0x1b3   : > { %v3484_v40 = vpop.f32.mrb[88].mxu0  ;;  %v3548_v45 = vpop.f32.mrb[88].mxu1 }
 0x1b4   : > { %v3485_v25 = vpop.f32.mrb[89].mxu0  ;;  %v3549_v17 = vpop.f32.mrb[89].mxu1 }
 0x1b5   : > { %v3486_v51 = vadd.f32 %v3485_v25, %v3484_v40  ;;  %v3550_v7 = vadd.f32 %v3549_v17, %v3548_v45  ;;  %v3487_v39 = vpop.f32.mrb[90].mxu0  ;;  %v3551_v38 = vpop.f32.mrb[90].mxu1 }
 0x1b6   : > { %v3488_v60 = vpop.f32.mrb[91].mxu0  ;;  %v3552_v1 = vpop.f32.mrb[91].mxu1 }
 0x1b7   : > { %v4852_v30 = vadd.f32 %v3486_v51, %v4756_v12  ;;  %v3489_v36 = vadd.f32 %v3488_v60, %v3487_v39  ;;  %v3553_v24 = vadd.f32 %v3552_v1, %v3551_v38  ;;  %v4855_v61 = vadd.f32 %v3550_v7, %v4759_v32 }
 0x1b9   : > { %v4858_v0 = vadd.f32 %v3489_v36, %v4762_v57  ;;  %v4861_v18 = vadd.f32 %v3553_v24, %v4765_v44 }
 0x1bb   : > { %v3490_v31 = vpop.f32.mrb[92].mxu0  ;;  %v3554_v6 = vpop.f32.mrb[92].mxu1 }
 0x1bc   : > { %v3491_v42 = vpop.f32.mrb[93].mxu0  ;;  %v3555_v10 = vpop.f32.mrb[93].mxu1 }
 0x1bd   : > { %v3492_v55 = vadd.f32 %v3491_v42, %v3490_v31  ;;  %v3556_v2 = vadd.f32 %v3555_v10, %v3554_v6  ;;  %v3493_v5 = vpop.f32.mrb[94].mxu0  ;;  %v3557_v12 = vpop.f32.mrb[94].mxu1 }
 0x1be   : > { %v3494_v14 = vpop.f32.mrb[95].mxu0  ;;  %v3558_v19 = vpop.f32.mrb[95].mxu1 }
 0x1bf   : > { %v4864_v59 = vadd.f32 %v3492_v55, %v4768_v15  ;;  %v3495_v32 = vadd.f32 %v3494_v14, %v3493_v5  ;;  %v3559_v8 = vadd.f32 %v3558_v19, %v3557_v12  ;;  %v4867_v57 = vadd.f32 %v3556_v2, %v4771_v3 }
 0x1c1   : > { %v4870_v44 = vadd.f32 %v3495_v32, %v4774_v34  ;;  %v4873_v26 = vadd.f32 %v3559_v8, %v4777_v23 }
 0x1c3   : > { %v3496_v46 = vpop.f32.mrb[96].mxu0  ;;  %v3560_v62 = vpop.f32.mrb[96].mxu1 }
 0x1c4   : > { %v3497_v50 = vpop.f32.mrb[97].mxu0  ;;  %v3561_v33 = vpop.f32.mrb[97].mxu1 }
 0x1c5   : > { %v3498_v40 = vadd.f32 %v3497_v50, %v3496_v46  ;;  %v3562_v45 = vadd.f32 %v3561_v33, %v3560_v62  ;;  %v3499_v25 = vpop.f32.mrb[98].mxu0  ;;  %v3563_v15 = vpop.f32.mrb[98].mxu1 }
 0x1c6   : > { %v3500_v17 = vpop.f32.mrb[99].mxu0  ;;  %v3564_v51 = vpop.f32.mrb[99].mxu1 }
 0x1c7   : > { %v4876_v7 = vadd.f32 %v3498_v40, %v4780_v63  ;;  %v3501_v3 = vadd.f32 %v3500_v17, %v3499_v25  ;;  %v3565_v39 = vadd.f32 %v3564_v51, %v3563_v15  ;;  %v4879_v34 = vadd.f32 %v3562_v45, %v4783_v28 }
 0x1c9   : > { %v4882_v23 = vadd.f32 %v3501_v3, %v4786_v4  ;;  %v4885_v38 = vadd.f32 %v3565_v39, %v4789_v29 }
 0x1cb   : > { %v3502_v60 = vpop.f32.mrb[100].mxu0  ;;  %v3566_v1 = vpop.f32.mrb[100].mxu1 }
 0x1cc   : > { %v3503_v36 = vpop.f32.mrb[101].mxu0  ;;  %v3567_v24 = vpop.f32.mrb[101].mxu1 }
 0x1cd   : > { %v3504_v31 = vadd.f32 %v3503_v36, %v3502_v60  ;;  %v3568_v6 = vadd.f32 %v3567_v24, %v3566_v1  ;;  %v3505_v42 = vpop.f32.mrb[102].mxu0  ;;  %v3569_v63 = vpop.f32.mrb[102].mxu1 }
 0x1ce   : > { %v3506_v10 = vpop.f32.mrb[103].mxu0  ;;  %v3570_v55 = vpop.f32.mrb[103].mxu1 }
 0x1cf   : > { %v4888_v2 = vadd.f32 %v3504_v31, %v4792_v16  ;;  %v3507_v28 = vadd.f32 %v3506_v10, %v3505_v42  ;;  %v3571_v5 = vadd.f32 %v3570_v55, %v3569_v63  ;;  %v4891_v4 = vadd.f32 %v3568_v6, %v4795_v56 }
 0x1d1   : > { %v4894_v29 = vadd.f32 %v3507_v28, %v4798_v47  ;;  %v4897_v12 = vadd.f32 %v3571_v5, %v4801_v53 }
 0x1d3   : > { %v3508_v14 = vpop.f32.mrb[104].mxu0  ;;  %v3572_v19 = vpop.f32.mrb[104].mxu1 }
 0x1d4   : > { %v3509_v32 = vpop.f32.mrb[105].mxu0  ;;  %v3573_v8 = vpop.f32.mrb[105].mxu1 }
 0x1d5   : > { %v3510_v46 = vadd.f32 %v3509_v32, %v3508_v14  ;;  %v3574_v62 = vadd.f32 %v3573_v8, %v3572_v19  ;;  %v3511_v50 = vpop.f32.mrb[106].mxu0  ;;  %v3575_v16 = vpop.f32.mrb[106].mxu1 }
 0x1d6   : > { %v3512_v33 = vpop.f32.mrb[107].mxu0  ;;  %v3576_v40 = vpop.f32.mrb[107].mxu1 }
 0x1d7   : > { %v4900_v45 = vadd.f32 %v3510_v46, %v4804_v43  ;;  %v3513_v56 = vadd.f32 %v3512_v33, %v3511_v50  ;;  %v3577_v25 = vadd.f32 %v3576_v40, %v3575_v16  ;;  %v4903_v47 = vadd.f32 %v3574_v62, %v4807_v13 }
 0x1d9   : > { %v4906_v53 = vadd.f32 %v3513_v56, %v4810_v52  ;;  %v4909_v15 = vadd.f32 %v3577_v25, %v4813_v11 }
 0x1db   : > { %v3514_v17 = vpop.f32.mrb[108].mxu0  ;;  %v3578_v51 = vpop.f32.mrb[108].mxu1 }
 0x1dc   : > { %v3515_v3 = vpop.f32.mrb[109].mxu0  ;;  %v3579_v39 = vpop.f32.mrb[109].mxu1 }
 0x1dd   : > { %v3516_v60 = vadd.f32 %v3515_v3, %v3514_v17  ;;  %v3580_v1 = vadd.f32 %v3579_v39, %v3578_v51  ;;  %v3517_v43 = vpop.f32.mrb[110].mxu0  ;;  %v3581_v36 = vpop.f32.mrb[110].mxu1 }
 0x1de   : > { %v3518_v24 = vpop.f32.mrb[111].mxu0  ;;  %v3582_v31 = vpop.f32.mrb[111].mxu1 }
 0x1df   : > { %v4912_v13 = vadd.f32 %v3516_v60, %v4816_v20  ;;  %v3519_v6 = vadd.f32 %v3518_v24, %v3517_v43  ;;  %v3583_v52 = vadd.f32 %v3582_v31, %v3581_v36  ;;  %v4915_v42 = vadd.f32 %v3580_v1, %v4819_v21 }
 0x1e1   : > { %v4918_v11 = vadd.f32 %v3519_v6, %v4822_v35  ;;  %v4924_v63 = vadd.f32 %v3583_v52, %v4825_v37 }
 0x1e3   : > { %v3584_v10 = vpop.f32.mrb[112].mxu1  ;;  %v3674_v55 = vpop.f32.mrb[112].mxu0 }
 0x1e4   : > { %v2198_v28 = vadd.f32 %v3674_v55, %v4843_v58  ;;  %v3585_v20 = vpop.f32.mrb[113].mxu1  ;;  %v2189_v5 = vpop.f32.mrb[113].mxu0 }
 0x1e5   : > { %v3586_v14 = vadd.f32 %v3585_v20, %v3584_v10  ;;  %v2190_v21 = vadd.f32 %v2189_v5, %v4831_v9  ;;  %v3587_v19 = vpop.f32.mrb[114].mxu1  ;;  %v3675_v32 = vpop.f32.mrb[114].mxu0 }
 0x1e6   : > { %v2201_v35 = vadd.f32 %v3675_v32, %v4849_v54  ;;  %v3588_v8 = vpop.f32.mrb[115].mxu1  ;;  %v2192_v46 = vpop.f32.mrb[115].mxu0  ;;  %v2516_v9 = vmul.f32 %v2198_v28, %v2198_v28 }
 0x1e7   : > { %v3589_v62 = vadd.f32 %v3588_v8, %v3587_v19  ;;  %v2193_v37 = vadd.f32 %v2192_v46, %v4837_v48  ;;  %v4932_v50 = vadd.f32 %v3586_v14, %v4828_v27  ;;  %v2514_v16 = vmul.f32 %v2190_v21, %v2190_v21 }
 0x1e8   : > { %v3097_v58 = vpack.c.bf16 %v2201_v35, %v2198_v28  ;;  %v2517_v51 = vmul.f32 %v2201_v35, %v2201_v35 }
 0x1e9   : > { %v3092_v33 = vpack.c.bf16 %v2193_v37, %v2190_v21  ;;  %v2476_v40 = vadd.f32 %v2193_v37, %v2190_v21  ;;  %v2515_v56 = vmul.f32 %v2193_v37, %v2193_v37  ;;  %v4935_v25 = vadd.f32 %v3589_v62, %v4834_v49 }
 0x1ea   : > { %3169 = vst [vmem:[%s4937_s22 + $0x8] sm:$0xff] %v3097_v58  }
 0x1eb   : > { %3093 = vst [vmem:[%s4937_s22] sm:$0xff] %v3092_v33   ;;  %v2477_v54 = vadd.f32 %v2476_v40, %v2198_v28  ;;  %v2546_v48 = vadd.f32 %v2515_v56, %v2514_v16  ;;  %v3590_v17 = vpop.f32.mrb[116].mxu1  ;;  %v3678_v27 = vpop.f32.mrb[116].mxu0 }
 0x1ec   : > { %v2214_v3 = vadd.f32 %v3678_v27, %v4867_v57  ;;  %v3591_v39 = vpop.f32.mrb[117].mxu1  ;;  %v2205_v60 = vpop.f32.mrb[117].mxu0 }
 0x1ed   : > { %v2547_v1 = vadd.f32 %v2546_v48, %v2516_v9  ;;  %v3592_v43 = vadd.f32 %v3591_v39, %v3590_v17  ;;  %v2206_v49 = vadd.f32 %v2205_v60, %v4855_v61  ;;  %v2478_v36 = vadd.f32 %v2477_v54, %v2201_v35  ;;  %v3593_v24 = vpop.f32.mrb[118].mxu1  ;;  %v3679_v31 = vpop.f32.mrb[118].mxu0 }
 0x1ee   : > { %v2217_v6 = vadd.f32 %v3679_v31, %v4873_v26  ;;  %v3594_v52 = vpop.f32.mrb[119].mxu1  ;;  %v2208_v10 = vpop.f32.mrb[119].mxu0  ;;  %v2520_v62 = vmul.f32 %v2214_v3, %v2214_v3 }
 0x1ef   : > { %v2479_v55 = vadd.f32 %v2478_v36, %v2206_v49  ;;  %v2518_v28 = vmul.f32 %v2206_v49, %v2206_v49  ;;  %v2548_v20 = vadd.f32 %v2547_v1, %v2517_v51  ;;  %v3595_v5 = vadd.f32 %v3594_v52, %v3593_v24 }
 0x1f0   : > { %v3107_v57 = vpack.c.bf16 %v2217_v6, %v2214_v3  ;;  %v2209_v14 = vadd.f32 %v2208_v10, %v4861_v18  ;;  %v4946_v21 = vadd.f32 %v3592_v43, %v4840_v22  ;;  %v2521_v9 = vmul.f32 %v2217_v6, %v2217_v6 }
 0x1f1   : > { %v2549_v61 = vadd.f32 %v2548_v20, %v2518_v28  ;;  %v4949_v19 = vadd.f32 %v3595_v5, %v4846_v41 }
 0x1f2   : > { %3171 = vst [vmem:[%s4937_s22 + $0x18] sm:$0xff] %v3107_v57   ;;  %v3102_v32 = vpack.c.bf16 %v2209_v14, %v2206_v49  ;;  %v2480_v26 = vadd.f32 %v2479_v55, %v2209_v14  ;;  %v2519_v35 = vmul.f32 %v2209_v14, %v2209_v14 }
 0x1f3   : > { %v3596_v8 = vpop.f32.mrb[120].mxu1  ;;  %v3682_v46 = vpop.f32.mrb[120].mxu0 }
 0x1f4   : > { %3170 = vst [vmem:[%s4937_s22 + $0x10] sm:$0xff] %v3102_v32   ;;  %v2481_v37 = vadd.f32 %v2480_v26, %v2214_v3  ;;  %v2550_v16 = vadd.f32 %v2549_v61, %v2519_v35  ;;  %v2230_v58 = vadd.f32 %v3682_v46, %v4891_v4  ;;  %v3597_v18 = vpop.f32.mrb[121].mxu1  ;;  %v2221_v33 = vpop.f32.mrb[121].mxu0 }
 0x1f5   : > { %v3598_v22 = vadd.f32 %v3597_v18, %v3596_v8  ;;  %v2222_v40 = vadd.f32 %v2221_v33, %v4879_v34  ;;  %v3599_v56 = vpop.f32.mrb[122].mxu1  ;;  %v3683_v41 = vpop.f32.mrb[122].mxu0 }
 0x1f6   : > { %v2551_v54 = vadd.f32 %v2550_v16, %v2520_v62  ;;  %v2482_v48 = vadd.f32 %v2481_v37, %v2217_v6  ;;  %v2233_v17 = vadd.f32 %v3683_v41, %v4897_v12  ;;  %v3600_v27 = vpop.f32.mrb[123].mxu1  ;;  %v2224_v51 = vpop.f32.mrb[123].mxu0  ;;  %v2524_v10 = vmul.f32 %v2230_v58, %v2230_v58 }
 0x1f7   : > { %v2522_v3 = vmul.f32 %v2222_v40, %v2222_v40  ;;  %v3601_v39 = vadd.f32 %v3600_v27, %v3599_v56  ;;  %v2225_v4 = vadd.f32 %v2224_v51, %v4885_v38  ;;  %v4958_v60 = vadd.f32 %v3598_v22, %v4852_v30 }
 0x1f8   : > { %v2483_v1 = vadd.f32 %v2482_v48, %v2222_v40  ;;  %v2552_v34 = vadd.f32 %v2551_v54, %v2521_v9  ;;  %v3117_v43 = vpack.c.bf16 %v2233_v17, %v2230_v58 }
 0x1f9   : > { %v3112_v49 = vpack.c.bf16 %v2225_v4, %v2222_v40  ;;  %v2523_v36 = vmul.f32 %v2225_v4, %v2225_v4  ;;  %v4961_v24 = vadd.f32 %v3601_v39, %v4858_v0  ;;  %v2525_v0 = vmul.f32 %v2233_v17, %v2233_v17 }
 0x1fa   : > { %v2553_v31 = vadd.f32 %v2552_v34, %v2522_v3  ;;  %3173 = vst [vmem:[%s4937_s22 + $0x28] sm:$0xff] %v3117_v43   ;;  %v2484_v12 = vadd.f32 %v2483_v1, %v2225_v4 }
 0x1fb   : > { %3172 = vst [vmem:[%s4937_s22 + $0x20] sm:$0xff] %v3112_v49   ;;  %v3602_v6 = vpop.f32.mrb[124].mxu1  ;;  %v3686_v52 = vpop.f32.mrb[124].mxu0 }
 0x1fc   : > { %v2485_v55 = vadd.f32 %v2484_v12, %v2230_v58  ;;  %v2554_v38 = vadd.f32 %v2553_v31, %v2523_v36  ;;  %v2246_v30 = vadd.f32 %v3686_v52, %v4915_v42  ;;  %v3603_v28 = vpop.f32.mrb[125].mxu1  ;;  %v2237_v20 = vpop.f32.mrb[125].mxu0 }
 0x1fd   : > { %v3604_v5 = vadd.f32 %v3603_v28, %v3602_v6  ;;  %v2238_v57 = vadd.f32 %v2237_v20, %v4903_v47  ;;  %v3605_v14 = vpop.f32.mrb[126].mxu1  ;;  %v3687_v61 = vpop.f32.mrb[126].mxu0 }
 0x1fe   : > { %v2555_v32 = vadd.f32 %v2554_v38, %v2524_v10  ;;  %v2486_v26 = vadd.f32 %v2485_v55, %v2233_v17  ;;  %v2249_v35 = vadd.f32 %v3687_v61, %v4924_v63  ;;  %v3606_v8 = vpop.f32.mrb[127].mxu1  ;;  %v2240_v46 = vpop.f32.mrb[127].mxu0  ;;  %v2528_v54 = vmul.f32 %v2246_v30, %v2246_v30 }
 0x1ff   : > { %v2526_v62 = vmul.f32 %v2238_v57, %v2238_v57  ;;  %v3607_v37 = vadd.f32 %v3606_v8, %v3605_v14  ;;  %v2241_v42 = vadd.f32 %v2240_v46, %v4909_v15  ;;  %v2117_v16 = vadd.f32 %v3604_v5, %v4864_v59 }
 0x200   : > { %v2487_v58 = vadd.f32 %v2486_v26, %v2238_v57  ;;  %v2556_v18 = vadd.f32 %v2555_v32, %v2525_v0  ;;  %v3127_v47 = vpack.c.bf16 %v2249_v35, %v2246_v30  ;;  %v2529_v1 = vmul.f32 %v2249_v35, %v2249_v35 }
 0x201   : > { %v3122_v33 = vpack.c.bf16 %v2241_v42, %v2238_v57  ;;  %v2527_v22 = vmul.f32 %v2241_v42, %v2241_v42  ;;  %v2120_v40 = vadd.f32 %v3607_v37, %v4870_v44 }
 0x202   : > { %v2557_v56 = vadd.f32 %v2556_v18, %v2526_v62  ;;  %3175 = vst [vmem:[%s4937_s22 + $0x38] sm:$0xff] %v3127_v47   ;;  %v2488_v41 = vadd.f32 %v2487_v58, %v2241_v42 }
 0x203   : > { %3174 = vst [vmem:[%s4937_s22 + $0x30] sm:$0xff] %v3122_v33   ;;  %v3608_v63 = vpop.f32.mrb[128].mxu1  ;;  %v3690_v9 = vpop.f32.mrb[128].mxu0 }
 0x204   : > { %v2489_v48 = vadd.f32 %v2488_v41, %v2246_v30  ;;  %v2558_v17 = vadd.f32 %v2557_v56, %v2527_v22  ;;  %v2262_v15 = vadd.f32 %v3690_v9, %v4946_v21  ;;  %v3609_v27 = vpop.f32.mrb[129].mxu1  ;;  %v2253_v59 = vpop.f32.mrb[129].mxu0 }
 0x205   : > { %v3610_v51 = vadd.f32 %v3609_v27, %v3608_v63  ;;  %v2254_v3 = vadd.f32 %v2253_v59, %v4932_v50  ;;  %v3611_v39 = vpop.f32.mrb[130].mxu1  ;;  %v3691_v4 = vpop.f32.mrb[130].mxu0 }
 0x206   : > { %v2559_v44 = vadd.f32 %v2558_v17, %v2528_v54  ;;  %v2490_v34 = vadd.f32 %v2489_v48, %v2249_v35  ;;  %v2265_v43 = vadd.f32 %v3691_v4, %v4949_v19  ;;  %v3612_v49 = vpop.f32.mrb[131].mxu1  ;;  %v2256_v36 = vpop.f32.mrb[131].mxu0  ;;  %v2532_v57 = vmul.f32 %v2262_v15, %v2262_v15 }
 0x207   : > { %v2530_v31 = vmul.f32 %v2254_v3, %v2254_v3  ;;  %v3613_v12 = vadd.f32 %v3612_v49, %v3611_v39  ;;  %v2257_v21 = vadd.f32 %v2256_v36, %v4935_v25  ;;  %v2125_v6 = vadd.f32 %v3610_v51, %v4876_v7 }
 0x208   : > { %v2491_v52 = vadd.f32 %v2490_v34, %v2254_v3  ;;  %v2560_v10 = vadd.f32 %v2559_v44, %v2529_v1  ;;  %v3137_v50 = vpack.c.bf16 %v2265_v43, %v2262_v15  ;;  %v2533_v46 = vmul.f32 %v2265_v43, %v2265_v43 }
 0x209   : > { %v3132_v55 = vpack.c.bf16 %v2257_v21, %v2254_v3  ;;  %v2531_v38 = vmul.f32 %v2257_v21, %v2257_v21  ;;  %v2128_v30 = vadd.f32 %v3613_v12, %v4882_v23 }
 0x20a   : > { %v2561_v28 = vadd.f32 %v2560_v10, %v2530_v31  ;;  %3177 = vst [vmem:[%s4937_s22 + $0x48] sm:$0xff] %v3137_v50   ;;  %v2492_v20 = vadd.f32 %v2491_v52, %v2257_v21 }
 0x20b   : > { %3176 = vst [vmem:[%s4937_s22 + $0x40] sm:$0xff] %v3132_v55   ;;  %v3614_v19 = vpop.f32.mrb[132].mxu1  ;;  %v3694_v5 = vpop.f32.mrb[132].mxu0 }
 0x20c   : > { %v2493_v14 = vadd.f32 %v2492_v20, %v2262_v15  ;;  %v2562_v61 = vadd.f32 %v2561_v28, %v2531_v38  ;;  %v2278_v0 = vadd.f32 %v3694_v5, %v2117_v16  ;;  %v3615_v25 = vpop.f32.mrb[133].mxu1  ;;  %v2269_v32 = vpop.f32.mrb[133].mxu0 }
 0x20d   : > { %v3616_v7 = vadd.f32 %v3615_v25, %v3614_v19  ;;  %v2270_v26 = vadd.f32 %v2269_v32, %v4958_v60  ;;  %v3617_v35 = vpop.f32.mrb[134].mxu1  ;;  %v3695_v8 = vpop.f32.mrb[134].mxu0 }
 0x20e   : > { %v2563_v62 = vadd.f32 %v2562_v61, %v2532_v57  ;;  %v2494_v23 = vadd.f32 %v2493_v14, %v2265_v43  ;;  %v2281_v37 = vadd.f32 %v3695_v8, %v2120_v40  ;;  %v3618_v42 = vpop.f32.mrb[135].mxu1  ;;  %v2272_v58 = vpop.f32.mrb[135].mxu0  ;;  %v2536_v15 = vmul.f32 %v2278_v0, %v2278_v0 }
 0x20f   : > { %v2534_v18 = vmul.f32 %v2270_v26, %v2270_v26  ;;  %v3619_v47 = vadd.f32 %v3618_v42, %v3617_v35  ;;  %v2273_v33 = vadd.f32 %v2272_v58, %v4961_v24  ;;  %v2133_v16 = vadd.f32 %v3616_v7, %v4888_v2 }
 0x210   : > { %v2495_v22 = vadd.f32 %v2494_v23, %v2270_v26  ;;  %v2564_v56 = vadd.f32 %v2563_v62, %v2533_v46  ;;  %v3147_v41 = vpack.c.bf16 %v2281_v37, %v2278_v0  ;;  %v2537_v44 = vmul.f32 %v2281_v37, %v2281_v37 }
 0x211   : > { %v3142_v60 = vpack.c.bf16 %v2273_v33, %v2270_v26  ;;  %v2535_v63 = vmul.f32 %v2273_v33, %v2273_v33  ;;  %v2136_v9 = vadd.f32 %v3619_v47, %v4894_v29 }
 0x212   : > { %v2565_v54 = vadd.f32 %v2564_v56, %v2534_v18  ;;  %3179 = vst [vmem:[%s4937_s22 + $0x58] sm:$0xff] %v3147_v41   ;;  %v2496_v48 = vadd.f32 %v2495_v22, %v2273_v33 }
 0x213   : > { %3178 = vst [vmem:[%s4937_s22 + $0x50] sm:$0xff] %v3142_v60   ;;  %v3620_v40 = vpop.f32.mrb[136].mxu1  ;;  %v3698_v17 = vpop.f32.mrb[136].mxu0 }
 0x214   : > { %v2497_v27 = vadd.f32 %v2496_v48, %v2278_v0  ;;  %v2566_v59 = vadd.f32 %v2565_v54, %v2535_v63  ;;  %v2294_v51 = vadd.f32 %v3698_v17, %v2133_v16  ;;  %v3621_v24 = vpop.f32.mrb[137].mxu1  ;;  %v2285_v3 = vpop.f32.mrb[137].mxu0 }
 0x215   : > { %v3622_v2 = vadd.f32 %v3621_v24, %v3620_v40  ;;  %v2286_v39 = vadd.f32 %v2285_v3, %v2125_v6  ;;  %v3623_v4 = vpop.f32.mrb[138].mxu1  ;;  %v3699_v1 = vpop.f32.mrb[138].mxu0 }
 0x216   : > { %v2567_v34 = vadd.f32 %v2566_v59, %v2536_v15  ;;  %v2498_v29 = vadd.f32 %v2497_v27, %v2281_v37  ;;  %v2297_v43 = vadd.f32 %v3699_v1, %v2136_v9  ;;  %v3624_v49 = vpop.f32.mrb[139].mxu1  ;;  %v2288_v36 = vpop.f32.mrb[139].mxu0  ;;  %v2540_v14 = vmul.f32 %v2294_v51, %v2294_v51 }
 0x217   : > { %v2538_v31 = vmul.f32 %v2286_v39, %v2286_v39  ;;  %v3625_v12 = vadd.f32 %v3624_v49, %v3623_v4  ;;  %v2289_v21 = vadd.f32 %v2288_v36, %v2128_v30  ;;  %v2141_v52 = vadd.f32 %v3622_v2, %v4900_v45 }
 0x218   : > { %v2499_v10 = vadd.f32 %v2498_v29, %v2286_v39  ;;  %v2568_v50 = vadd.f32 %v2567_v34, %v2537_v44  ;;  %v3157_v55 = vpack.c.bf16 %v2297_v43, %v2294_v51  ;;  %v2541_v35 = vmul.f32 %v2297_v43, %v2297_v43 }
 0x219   : > { %v3152_v38 = vpack.c.bf16 %v2289_v21, %v2286_v39  ;;  %v2539_v6 = vmul.f32 %v2289_v21, %v2289_v21  ;;  %v2144_v28 = vadd.f32 %v3625_v12, %v4906_v53 }
 0x21a   : > { %v2569_v20 = vadd.f32 %v2568_v50, %v2538_v31  ;;  %3181 = vst [vmem:[%s4937_s22 + $0x68] sm:$0xff] %v3157_v55   ;;  %v2500_v19 = vadd.f32 %v2499_v10, %v2289_v21 }
 0x21b   : > { %3180 = vst [vmem:[%s4937_s22 + $0x60] sm:$0xff] %v3152_v38   ;;  %v3626_v5 = vpop.f32.mrb[140].mxu1  ;;  %v3702_v57 = vpop.f32.mrb[140].mxu0 }
 0x21c   : > { %v2501_v61 = vadd.f32 %v2500_v19, %v2294_v51  ;;  %v2570_v0 = vadd.f32 %v2569_v20, %v2539_v6  ;;  %v3627_v25 = vpop.f32.mrb[141].mxu1  ;;  %v2301_v30 = vpop.f32.mrb[141].mxu0 }
 0x21d   : > { %v3628_v32 = vadd.f32 %v3627_v25, %v3626_v5  ;;  %v2302_v45 = vadd.f32 %v2301_v30, %v2141_v52  ;;  %v3629_v7 = vpop.f32.mrb[142].mxu1  ;;  %v3703_v26 = vpop.f32.mrb[142].mxu0 }
 0x21e   : > { %v2571_v8 = vadd.f32 %v2570_v0, %v2540_v14  ;;  %v2502_v53 = vadd.f32 %v2501_v61, %v2297_v43  ;;  %v3630_v46 = vpop.f32.mrb[143].mxu1  ;;  %v2304_v62 = vpop.f32.mrb[143].mxu0 }
 0x21f   : > { %v2149_v23 = vadd.f32 %v3628_v32, %v4912_v13  ;;  %v2542_v37 = vmul.f32 %v2302_v45, %v2302_v45  ;;  %v3631_v42 = vadd.f32 %v3630_v46, %v3629_v7  ;;  %v2305_v58 = vadd.f32 %v2304_v62, %v2144_v28 }
 0x220   : > { %v2503_v18 = vadd.f32 %v2502_v53, %v2302_v45  ;;  %v2572_v47 = vadd.f32 %v2571_v8, %v2541_v35 }
 0x221   : > { %v2310_v33 = vadd.f32 %v3702_v57, %v2149_v23  ;;  %v2152_v16 = vadd.f32 %v3631_v42, %v4918_v11  ;;  %v3162_v22 = vpack.c.bf16 %v2305_v58, %v2302_v45  ;;  %v2543_v56 = vmul.f32 %v2305_v58, %v2305_v58 }
 0x222   : > { %v2573_v41 = vadd.f32 %v2572_v47, %v2542_v37  ;;  %v2504_v60 = vadd.f32 %v2503_v18, %v2305_v58 }
 0x223   : > { %v2544_v63 = vmul.f32 %v2310_v33, %v2310_v33  ;;  %v2313_v9 = vadd.f32 %v3703_v26, %v2152_v16  ;;  %3182 = vst [vmem:[%s4937_s22 + $0x70] sm:$0xff] %v3162_v22  }
 0x224   : > { %v2505_v13 = vadd.f32 %v2504_v60, %v2310_v33  ;;  %v2574_v54 = vadd.f32 %v2573_v41, %v2543_v56 }
 0x225   : > { %v3167_v11 = vpack.c.bf16 %v2313_v9, %v2310_v33  ;;  %v2545_v48 = vmul.f32 %v2313_v9, %v2313_v9 }
 0x226   : > { %v2506_v40 = vadd.f32 %v2505_v13, %v2313_v9  ;;  %v2575_v17 = vadd.f32 %v2574_v54, %v2544_v63 }
 0x227   : > { %3183 = vst [vmem:[%s4937_s22 + $0x78] sm:$0xff] %v3167_v11  }
 0x228   : > { %v2507_v15 = vrot.slane %v2506_v40, 4  ;;  %v2576_v27 = vadd.f32 %v2575_v17, %v2545_v48 }
 0x229   : > { %3857 = shalt.err (!%p3854_p3)
}
 0x22a   : > { %s3858_s11 = scalar_lea.hbm %s4999_s30, 2048  ;;  %s3862_s14 = scalar_lea.hbm %s5117_s2, 4096 }
 0x22b   : > { %p3859_p4 = scmp.ne.s32.totalorder %s4999_s30, %s3858_s11  ;;  %p3863_p9 = scmp.lt.u32.totalorder %s4999_s30, %s5117_s2 }
 0x22c   : > { %p3864_p10 = scmp.lt.u32.totalorder %s3862_s14, %s3858_s11  ;;  %p3866_p12 = scmp.lt.u32.totalorder %s3858_s11, %s4999_s30 }
 0x22d   : > { %p3860_p7 = pnand %p3859_p4, %p4038_p5 }
 0x22e   : > { %p3865_p11 = por %p3864_p10, %p3863_p9 }
 0x22f   : > { %p3861_p8 = pneg %p3860_p7 }
 0x230   : > { %p3867_p13 = por %p3866_p12, %p3865_p11 }
 0x232   : > { %p3868_p0 = pnand %p3867_p13, %p3861_p8 }
 0x234   : > { %3871 = shalt.err (!%p3868_p0)
}
 0x235   : > { %s3969_s28 = smov 64   ;;  %s3970_s29 = smov 4   ;;  %v2577_v59 = vrot.slane %v2576_v27, 4  ;;  %v2508_v51 = vadd.f32 %v2507_v15, %v2506_v40 }
 0x236   : > { %3721 = dma.vmem_to_hbm [thread:$0]  (%p4038_p5), %s5001_s27, 2048, %s4999_s30, %s2585_s5, %s3969_s28, %s3969_s28, %s3970_s29  }
 0x237   : > { %v2509_v24 = vrot.slane %v2508_v51, 2  ;;  %v2578_v3 = vadd.f32 %v2577_v59, %v2576_v27  ;;  %s2589_s6 = sand.u32 1, %s4019_s19   ;;  %s3052_s8 = sshll.u32 %s4019_s19, 4 }
 0x238   : > { %s200_s9 = scalar_lea.vmem [#allocation5], %s4921_s7  ;;  %s206_s11 = scalar_lea.vmem [#allocation7], %s4921_s7 }
 0x239   : > { %v2510_v2 = vadd.f32 %v2509_v24, %v2508_v51  ;;  %v2579_v39 = vrot.slane %v2578_v3, 2  ;;  %s2622_s10 = sshll.u32 %s200_s9, 4  ;;  %s2635_s12 = sshll.u32 %s206_s11, 4  ;;  %s5039_s10 = int_to_ptr.vmem [resolvable:$true] %s2622_s10  ;;  %s5046_s12 = int_to_ptr.vmem [resolvable:$true] %s2635_s12 }
 0x23a   : > { %s5037_s27 = scalar_lea.hbm %s5118_s3, %s3052_s8  ;;  %s5044_s5 = scalar_lea.hbm %s5119_s4, %s3052_s8 }
 0x23b   : > { %v2511_v4 = vrot.slane %v2510_v2, 1  ;;  %v2580_v1 = vadd.f32 %v2579_v39, %v2578_v3  ;;  %s5048_s22 = scalar_lea.sflag [#allocation6], %s2589_s6  ;;  %s3872_s23 = scalar_lea.vmem %s5039_s10, 16 }
 0x23c   : > { %p3873_p1 = scmp.ne.s32.totalorder %s5039_s10, %s3872_s23  ;;  %s3971_s28 = smov [#allocation5]  }
 0x23d   : > { %v2512_v44 = vadd.f32 %v2511_v4, %v2510_v2  ;;  %v2581_v34 = vrot.slane %v2580_v1, 1  ;;  %s3876_s29 = sshll.u32 %s3971_s28, 4  ;;  %s3877_s29 = int_to_ptr.vmem [resolvable:$false] %s3876_s29 }
 0x23e   : > { %p3874_p2 = pnand %p3873_p1, %p4038_p5  ;;  %s3878_s13 = scalar_lea.vmem %s3877_s29, 32 }
 0x23f   : > { %2513 = vst [vmem:[%s200_s9] sm:$0x1] %v2512_v44  ;;  %v2582_v29 = vadd.f32 %v2581_v34, %v2580_v1  ;;  %p3879_p4 = scmp.lt.s32.totalorder %s5039_s10, %s3877_s29  ;;  %p3880_p7 = scmp.lt.s32.totalorder %s3878_s13, %s3872_s23 }
 0x240   : > { %p3875_p3 = pneg %p3874_p2 }
 0x241   : > { %p3881_p8 = por %p3880_p7, %p3879_p4 }
 0x243   : > { %p3882_p9 = pnand %p3881_p8, %p3875_p3 }
 0x245   : > { %3885 = shalt.err (!%p3882_p9)
}
 0x246   : > { %s3886_s6 = scalar_lea.hbm %s5037_s27, 16  ;;  %s3890_s14 = scalar_lea.hbm %s5118_s3, 32 }
 0x247   : > { %p3887_p10 = scmp.ne.s32.totalorder %s5037_s27, %s3886_s6  ;;  %p3891_p13 = scmp.lt.u32.totalorder %s5037_s27, %s5118_s3 }
 0x248   : > { %p3892_p0 = scmp.lt.u32.totalorder %s3890_s14, %s3886_s6  ;;  %p3894_p2 = scmp.lt.u32.totalorder %s3886_s6, %s5037_s27 }
 0x249   : > { %p3888_p11 = pnand %p3887_p10, %p4038_p5 }
 0x24a   : > { %p3893_p1 = por %p3892_p0, %p3891_p13 }
 0x24b   : > { %p3889_p12 = pneg %p3888_p11 }
 0x24c   : > { %p3895_p3 = por %p3894_p2, %p3893_p1 }
 0x24e   : > { %p3896_p4 = pnand %p3895_p3, %p3889_p12 }
 0x250   : > { %3899 = shalt.err (!%p3896_p4)
}
 0x251   : > { %3722 = dma.vmem_to_hbm [thread:$0]  (%p4038_p5), %s5039_s10, 16, %s5037_s27, %s5048_s22   ;;  %2583 = vst [vmem:[%s206_s11] sm:$0x1] %v2582_v29 }
 0x252   : > { %s3900_s23 = scalar_lea.vmem %s5046_s12, 16  ;;  %s3972_s28 = smov [#allocation7]  }
 0x253   : > { %p3901_p7 = scmp.ne.s32.totalorder %s5046_s12, %s3900_s23  ;;  %s3904_s29 = sshll.u32 %s3972_s28, 4  ;;  %s3905_s29 = int_to_ptr.vmem [resolvable:$false] %s3904_s29 }
 0x254   : > { %s3906_s13 = scalar_lea.vmem %s3905_s29, 32  ;;  %p3907_p10 = scmp.lt.s32.totalorder %s5046_s12, %s3905_s29 }
 0x255   : > { %p3902_p8 = pnand %p3901_p7, %p4038_p5  ;;  %p3908_p11 = scmp.lt.s32.totalorder %s3906_s13, %s3900_s23 }
 0x257   : > { %p3903_p9 = pneg %p3902_p8  ;;  %p3909_p12 = por %p3908_p11, %p3907_p10 }
 0x259   : > { %p3910_p13 = pnand %p3909_p12, %p3903_p9 }
 0x25b   : > { %3913 = shalt.err (!%p3910_p13)
}
 0x25c   : > { %s3914_s7 = scalar_lea.hbm %s5044_s5, 16  ;;  %s3918_s27 = scalar_lea.hbm %s5119_s4, 32 }
 0x25d   : > { %p3915_p0 = scmp.ne.s32.totalorder %s5044_s5, %s3914_s7  ;;  %p3919_p3 = scmp.lt.u32.totalorder %s5044_s5, %s5119_s4 }
 0x25e   : > { %p3920_p4 = scmp.lt.u32.totalorder %s3918_s27, %s3914_s7  ;;  %p3922_p8 = scmp.lt.u32.totalorder %s3914_s7, %s5044_s5 }
 0x25f   : > { %p3916_p1 = pnand %p3915_p0, %p4038_p5 }
 0x260   : > { %p3921_p7 = por %p3920_p4, %p3919_p3 }
 0x261   : > { %p3917_p2 = pneg %p3916_p1 }
 0x262   : > { %p3923_p9 = por %p3922_p8, %p3921_p7 }
 0x264   : > { %p3924_p10 = pnand %p3923_p9, %p3917_p2 }
 0x266   : > { %3927 = shalt.err (!%p3924_p10)
}
 0x267   : > { %3723 = dma.vmem_to_hbm [thread:$0]  (%p4038_p5), %s5046_s12, 16, %s5044_s5, %s5048_s22  }
 0x268 PF: > { %p3737_p11 = scmp.ge.s32.totalorder %s3966_s18, 2  ;;  %s2647_s9 = sand.u32 1, %s3954_s15  }
 0x269   : > { %s2648_s14 = scalar_lea.sflag [#allocation4], %s2647_s9 }
 0x26a   : > { %p3728_p12 = pnand %p3737_p11, %p4042_p6 }
 0x26c   : > { %3945 = dma.done.wait (!%p3728_p12), %s2648_s14, 2048  }
 0x26d   : > { %3947 = vsyncadd (!%p3728_p12), %s2648_s14, 4294965248  ;;  %s2656_s19 = sand.u32 1, %s2747_s20  }
 0x26e   : > { %s2657_s30 = scalar_lea.sflag [#allocation6], %s2656_s19 }
 0x26f   : > { %3949 = dma.done.wait (!%p3728_p12), %s2657_s30, 32  }
 0x270   : > { %3951 = vsyncadd (!%p3728_p12), %s2657_s30, 4294967264  ;;  %p18_p5 = scmp.ge.s32.totalorder %s4023_s21, 4   ;;  %s5122_s15 = smov %s3958_s16 }
 0x271   : > { %s5123_s16 = smov %s3962_s17  ;;  %s5124_s17 = smov %s4036_s24 }
 0x272   : > { %s5125_s18 = smov %s4023_s21  ;;  %20 = sbr.rel (!%p18_p5) target bundleno = 5 (0x5), region = 97 }
 0x279   :  { %2669 = vsyncpa [#allocation4], 1 }
 0x27a   :  { %2671 = vsyncpa [#allocation4 + $0x1], 1 }
 0x27b   :  { %2672 = vsyncpa [#allocation6], 1 }
 0x27c   :  { %2674 = vsyncpa [#allocation6 + $0x1], 1 }

</bundles_post_ra>
